<compile_context>
chip_gen: v5e
topology: v5e:2x2
jax: 0.10.0
libtpu: 0.0.40
codegen_flags: <defaults>
</compile_context>

<pallas_src>
from functools import partial

import jax
import jax.numpy as jnp
from jax import lax
from jax.experimental import pallas as pl
from jax.experimental.pallas import tpu as pltpu

# Fixed trunk channel widths of the module.
STN_C1, STN_C2 = 16, 64      # STN Conv1d(k,16,1) -> Conv1d(16,64,1)
PTN_C1, PTN_C2 = 32, 128     # PTN Conv1d(F,32,1) -> Conv1d(32,128,1)


# ---------------------------------------------------------------------------
# Shared math helpers (used by both the Pallas kernel and the pure-JAX
# reference so the two paths have identical numerics).
# ---------------------------------------------------------------------------

def _relu(v):
    return jnp.maximum(v, 0.0)


def stn_point_features(xy, w1, b1, w2, b2):
    """STN point trunk.  xy: (2, T) bf16 -> (64, T) f32.

    The Cin=2 first conv is two VPU broadcast FMAs instead of an MXU matmul
    (an MXU pass would still stream all T columns for a 2-wide weight).
    """
    xyf = xy.astype(jnp.float32)
    w1f = w1.astype(jnp.float32)
    h1 = _relu(w1f[:, 0:1] * xyf[0:1, :] + w1f[:, 1:2] * xyf[1:2, :] + b1)
    h2 = _relu(jnp.dot(w2, h1.astype(w2.dtype),
                       preferred_element_type=jnp.float32) + b2)
    return h2


def stn_head_cm(pooled, w3, b3, w4, b4, wp_cm, bp_eye_cm):
    """STN head.  pooled: (64,1) f32 -> column-major flattened transform (k*k,1).

    wp_cm / bp_eye_cm rows are pre-permuted to column-major transform order
    (t00, t10, t01, t11) with the identity folded into the bias, so the kernel
    never reshapes the (k*k,1) vector into (k,k).
    """
    h3 = _relu(jnp.dot(w3, pooled, preferred_element_type=jnp.float32) + b3)
    h4 = _relu(jnp.dot(w4, h3, preferred_element_type=jnp.float32) + b4)
    return jnp.dot(wp_cm, h4, preferred_element_type=jnp.float32) + bp_eye_cm


def fold_transform_into_w1(w1, tvec_cm):
    """Fold the 2x2 STN transform into the first PTN conv weight.

    w1: (32, F) bf16, tvec_cm: (k*k, 1) f32 column-major transform.
    Returns (32, F) bf16 with W1_eff[:, :2] = W1[:, :2] @ trans, so the PTN
    conv1 per tile is a single matmul (no separate trans@xy stream).
    """
    w1f = w1.astype(jnp.float32)
    w1xy = w1f[:, 0:2]
    c0 = jnp.dot(w1xy, tvec_cm[0:2, :], preferred_element_type=jnp.float32)
    c1 = jnp.dot(w1xy, tvec_cm[2:4, :], preferred_element_type=jnp.float32)
    return jnp.concatenate([c0, c1, w1f[:, 2:]], axis=1).astype(jnp.bfloat16)


def ptn_point_features(xt, w1_eff, b1, w2, b2):
    """PointNet point trunk on a bf16 tile, transform pre-folded into w1_eff."""
    h1 = _relu(jnp.dot(w1_eff, xt, preferred_element_type=jnp.float32) + b1)
    h2 = _relu(jnp.dot(w2, h1.astype(w2.dtype),
                       preferred_element_type=jnp.float32) + b2)
    return h2


def ptn_head(pooled, xg, w3a, w3b, b3, w4, b4, w5a, b5a, w5b, b5b):
    """PointNet MLP head.  pooled: (128,1), xg: (G,1) -> (out_features, 1)."""
    h3 = _relu(jnp.dot(w3a, pooled, preferred_element_type=jnp.float32)
               + jnp.dot(w3b, xg, preferred_element_type=jnp.float32) + b3)
    h4 = _relu(jnp.dot(w4, h3, preferred_element_type=jnp.float32) + b4)
    h5 = _relu(jnp.dot(w5a, h4, preferred_element_type=jnp.float32) + b5a)
    return jnp.dot(w5b, h5, preferred_element_type=jnp.float32) + b5b


# ---------------------------------------------------------------------------
# Kernel
# ---------------------------------------------------------------------------

def _unpack(ref, slices, i):
    """Static slice of a row-packed parameter array."""
    off, (r, c) = slices[i]
    return ref[off:off + r, 0:c]


def _slab_max(h):
    """Lane-dense partial max: (C, T) -> (C, 128) via VPU maxes over 128-lane slabs."""
    t = h.shape[-1]
    m = h[:, 0:128]
    for s in range(1, t // 128):
        m = jnp.maximum(m, h[:, s * 128:(s + 1) * 128])
    return m


def _pointnet_fused_kernel(pw_sl, pb_sl, hw_sl, hb_sl, nt, tile_n,
                           x_ref, xg_ref, pw_ref, pb_ref, hw_ref, hb_ref,
                           out_ref, x_cache, stn_acc):
    t = pl.program_id(1)

    @pl.when(t == 0)
    def _init():
        stn_acc[...] = jnp.full(stn_acc.shape, -jnp.inf, stn_acc.dtype)

    # ---- stream this point tile once: cast f32->bf16 in VMEM, cache, STN trunk ----
    xt = x_ref[0].astype(jnp.bfloat16)                      # (F, T)
    off = pl.multiple_of(t * tile_n, 128)
    x_cache[:, pl.ds(off, tile_n)] = xt

    w1 = _unpack(pw_ref, pw_sl, 0)
    b1 = _unpack(pb_ref, pb_sl, 0)
    w2 = _unpack(pw_ref, pw_sl, 1)
    b2 = _unpack(pb_ref, pb_sl, 1)
    h2 = stn_point_features(xt[0:2, :], w1, b1, w2, b2)     # (64, T) f32
    # F.max_pool1d over all N == running lane-dense max over the tiles (VPU);
    # the single cross-lane reduce happens once per batch element below.
    stn_acc[...] = jnp.maximum(stn_acc[...], _slab_max(h2))

    # ---- last tile of this batch element: STN head, then PTN from the VMEM cache ----
    @pl.when(t == nt - 1)
    def _finish():
        pooled_s = jnp.max(stn_acc[...], axis=-1, keepdims=True)        # (64, 1)
        w3 = _unpack(hw_ref, hw_sl, 0)
        b3 = _unpack(hb_ref, hb_sl, 0)
        w4 = _unpack(hw_ref, hw_sl, 1)
        b4 = _unpack(hb_ref, hb_sl, 1)
        wp = _unpack(hw_ref, hw_sl, 2)
        bp = _unpack(hb_ref, hb_sl, 2)
        tvec = stn_head_cm(pooled_s, w3, b3, w4, b4, wp, bp)            # (k*k, 1)

        pw1 = _unpack(pw_ref, pw_sl, 2)
        pb1 = _unpack(pb_ref, pb_sl, 2)
        pw2 = _unpack(pw_ref, pw_sl, 3)
        pb2 = _unpack(pb_ref, pb_sl, 3)
        w1_eff = fold_transform_into_w1(pw1, tvec)                      # (32, F) bf16

        # torch.bmm(trans, xy) + Conv1d(F,32,1) + Conv1d(32,128,1) + max-pool,
        # streamed from the VMEM x cache (x is never re-read from HBM).
        def body(i, m):
            o = pl.multiple_of(i * tile_n, 128)
            h = ptn_point_features(x_cache[:, pl.ds(o, tile_n)],
                                   w1_eff, pb1, pw2, pb2)               # (128, T)
            return jnp.maximum(m, _slab_max(h))

        m0 = jnp.full((PTN_C2, 128), -jnp.inf, jnp.float32)
        pooled_p = jnp.max(lax.fori_loop(0, nt, body, m0, unroll=nt <= 8),
                           axis=-1, keepdims=True)                      # (128, 1)

        xg = xg_ref[0]                                                  # (G, 1)
        hw3 = _unpack(hw_ref, hw_sl, 3)
        hb3 = _unpack(hb_ref, hb_sl, 3)
        hw4 = _unpack(hw_ref, hw_sl, 4)
        hb4 = _unpack(hb_ref, hb_sl, 4)
        hw5a = _unpack(hw_ref, hw_sl, 5)
        hb5a = _unpack(hb_ref, hb_sl, 5)
        hw5b = _unpack(hw_ref, hw_sl, 6)
        hb5b = _unpack(hb_ref, hb_sl, 6)
        o = ptn_head(pooled_p, xg,
                     hw3[:, :PTN_C2], hw3[:, PTN_C2:], hb3,
                     hw4, hb4, hw5a, hb5a, hw5b, hb5b)                  # (OUT, 1)
        out_ref[...] = o[None]


# ---------------------------------------------------------------------------
# Parameters (synthetic, BatchNorm folded in eval mode) + packing
# ---------------------------------------------------------------------------

def fold_bn(w, b, gamma, beta, mean, var, eps=1e-5):
    """Fold eval-mode BatchNorm into a preceding (Cout, Cin) weight/bias."""
    scale = gamma / jnp.sqrt(var + eps)
    w_eff = w * scale[:, None]
    b_eff = (b - mean) * scale + beta
    return w_eff.astype(jnp.float32), b_eff[:, None].astype(jnp.float32)


def pack_rows(mats, dtype, align=8):
    """Row-pack 2-D matrices into one array.

    Row offsets are `align`-aligned (16 for bf16 packs: the bf16 sublane tile
    is (16,128), so unaligned offsets would force a relayout copy on every
    in-kernel slice).  Returns (packed, slices) with slices[i] =
    (row_offset, (rows_i, cols_i)) used for static slicing inside the kernel.
    """
    ncols = max(int(m.shape[1]) for m in mats)
    offs, nrows = [], 0
    for m in mats:
        offs.append(nrows)
        nrows += -(-int(m.shape[0]) // align) * align
    packed = jnp.zeros((nrows, ncols), dtype)
    for m, off in zip(mats, offs):
        packed = packed.at[off:off + m.shape[0], :m.shape[1]].set(m.astype(dtype))
    slices = tuple((off, (int(m.shape[0]), int(m.shape[1])))
                   for m, off in zip(mats, offs))
    return packed, slices


class _KeyGen:
    def __init__(self, key):
        self._key = key

    def __call__(self):
        self._key, sub = jax.random.split(self._key)
        return sub


def make_params(key, *, num_features=6, num_global_features=7,
                out_features=4, k=2):
    """Deterministic synthetic parameters matching PointNet.__init__ shapes."""
    kg = _KeyGen(key)

    def lin(cout, cin):
        w = jax.random.normal(kg(), (cout, cin), jnp.float32) / jnp.sqrt(cin)
        b = 0.1 * jax.random.normal(kg(), (cout,), jnp.float32)
        return w, b

    def bn(c):
        gamma = jax.random.uniform(kg(), (c,), jnp.float32, minval=0.5, maxval=1.5)
        beta = 0.1 * jax.random.normal(kg(), (c,), jnp.float32)
        mean = 0.1 * jax.random.normal(kg(), (c,), jnp.float32)
        var = jax.random.uniform(kg(), (c,), jnp.float32, minval=0.5, maxval=1.5)
        return gamma, beta, mean, var

    # ----- STNkd(k=2) -----
    s_w1, s_b1 = fold_bn(*lin(STN_C1, k), *bn(STN_C1))      # Conv1d(k,16,1)+BN
    s_w2, s_b2 = fold_bn(*lin(STN_C2, STN_C1), *bn(STN_C2))  # Conv1d(16,64,1)+BN
    s_w3, s_b3 = fold_bn(*lin(32, STN_C2), *bn(32))          # Linear(64,32)+BN
    s_w4, s_b4 = fold_bn(*lin(16, 32), *bn(16))              # Linear(32,16)+BN
    # NOTE: stn_proj is zero-initialized in the PyTorch module (transform == I
    # at init); small random values are used here so the correctness check
    # actually exercises the STN data path.  The identity is folded into the
    # bias and rows are permuted to column-major transform order.
    s_wp, s_bp = lin(k * k, 16)
    s_wp = 0.2 * s_wp
    s_bp_eye = s_bp[:, None] + jnp.eye(k, dtype=jnp.float32).reshape(k * k, 1)
    perm = jnp.array([i * k + j for j in range(k) for i in range(k)], jnp.int32)
    s_wp_cm = s_wp[perm, :]
    s_bp_eye_cm = s_bp_eye[perm, :]

    # ----- PointNet trunk / head -----
    p_w1, p_b1 = fold_bn(*lin(PTN_C1, num_features), *bn(PTN_C1))
    p_w2, p_b2 = fold_bn(*lin(PTN_C2, PTN_C1), *bn(PTN_C2))
    p_w3, p_b3 = fold_bn(*lin(34, PTN_C2 + num_global_features), *bn(34))
    p_w4, p_b4 = fold_bn(*lin(32, 34), *bn(32))
    p_w5a, p_b5a = fold_bn(*lin(32, 32), *bn(32))
    p_w5b, p_b5b_v = lin(out_features, 32)                   # final Linear (no BN/ReLU)
    p_b5b = p_b5b_v[:, None]

    # Point-wise (per-tile) conv weights in bf16; biases and head weights f32.
    raw = dict(
        stn_w1=s_w1.astype(jnp.bfloat16), stn_b1=s_b1,
        stn_w2=s_w2.astype(jnp.bfloat16), stn_b2=s_b2,
        stn_w3=s_w3, stn_b3=s_b3, stn_w4=s_w4, stn_b4=s_b4,
        stn_wp_cm=s_wp_cm, stn_bp_eye_cm=s_bp_eye_cm,
        ptn_w1=p_w1.astype(jnp.bfloat16), ptn_b1=p_b1,
        ptn_w2=p_w2.astype(jnp.bfloat16), ptn_b2=p_b2,
        ptn_w3=p_w3, ptn_b3=p_b3, ptn_w4=p_w4, ptn_b4=p_b4,
        ptn_w5a=p_w5a, ptn_b5a=p_b5a, ptn_w5b=p_w5b, ptn_b5b=p_b5b,
    )

    # Pack all small parameters into 4 arrays (4 resident DMAs per call).
    pw, pw_sl = pack_rows(
        [raw["stn_w1"], raw["stn_w2"], raw["ptn_w1"], raw["ptn_w2"]],
        jnp.bfloat16, align=16)
    pb, pb_sl = pack_rows(
        [raw["stn_b1"], raw["stn_b2"], raw["ptn_b1"], raw["ptn_b2"]],
        jnp.float32, align=8)
    hw, hw_sl = pack_rows(
        [raw["stn_w3"], raw["stn_w4"], raw["stn_wp_cm"],
         raw["ptn_w3"], raw["ptn_w4"], raw["ptn_w5a"], raw["ptn_w5b"]],
        jnp.float32, align=8)
    hb, hb_sl = pack_rows(
        [raw["stn_b3"], raw["stn_b4"], raw["stn_bp_eye_cm"],
         raw["ptn_b3"], raw["ptn_b4"], raw["ptn_b5a"], raw["ptn_b5b"]],
        jnp.float32, align=8)

    return dict(
        raw=raw,
        dims=dict(k=k, F=num_features, G=num_global_features, OUT=out_features),
        pw=pw, pw_sl=pw_sl, pb=pb, pb_sl=pb_sl,
        hw=hw, hw_sl=hw_sl, hb=hb, hb_sl=hb_sl,
    )


# ---------------------------------------------------------------------------
# pallas_call wrapper
# ---------------------------------------------------------------------------

def _param_spec(arr):
    """Whole (small) parameter array resident in VMEM; the block index is
    constant across the grid so it is only DMA'd once per call."""
    zeros = (0,) * arr.ndim
    return pl.BlockSpec(tuple(arr.shape), lambda b, t: zeros)


def _round_up(v, m):
    return -(-v // m) * m


def _run_fused(x_f32, x_global, params, tile_n):
    B, F, N = x_f32.shape
    dims = params["dims"]
    G, OUT = dims["G"], dims["OUT"]
    nt = N // tile_n

    kernel = partial(_pointnet_fused_kernel,
                     params["pw_sl"], params["pb_sl"],
                     params["hw_sl"], params["hb_sl"], nt, tile_n)

    xg_col = x_global.reshape(B, G, 1).astype(jnp.float32)

    param_bytes = sum(int(params[n].size) * params[n].dtype.itemsize
                      for n in ("pw", "pb", "hw", "hb"))

    # VMEM budget: double-buffered f32 x blocks + bf16 x cache (sublanes pad to
    # 16) + trunk intermediates (2x slack) + params/accumulators.  Only raise
    # vmem_limit_bytes when the smallest scoped default (16 MiB on v5e) would
    # not do; re-derive per generation (v7x: 64 MiB physical).
    vmem_need = (2 * F * tile_n * 4 + 16 * N * 2
                 + (STN_C1 + STN_C2 + PTN_C1 + PTN_C2) * tile_n * 4 * 2
                 + param_bytes + (2 << 20))
    compiler_kwargs = {}
    if vmem_need > 14 * 1024 * 1024:
        compiler_kwargs["vmem_limit_bytes"] = min(
            int(vmem_need * 3 // 2), 120 * 1024 * 1024)

    out_col = pl.pallas_call(
        kernel,
        out_shape=jax.ShapeDtypeStruct((B, OUT, 1), jnp.float32),
        grid_spec=pltpu.PrefetchScalarGridSpec(
            num_scalar_prefetch=0,
            grid=(B, nt),
            in_specs=[
                pl.BlockSpec((1, F, tile_n), lambda b, t: (b, 0, t)),
                pl.BlockSpec((1, G, 1), lambda b, t: (b, 0, 0)),   # 1 DMA per b
                _param_spec(params["pw"]),
                _param_spec(params["pb"]),
                _param_spec(params["hw"]),
                _param_spec(params["hb"]),
            ],
            out_specs=pl.BlockSpec((1, OUT, 1), lambda b, t: (b, 0, 0)),
            scratch_shapes=[
                pltpu.VMEM((F, N), jnp.bfloat16),        # per-batch-element x cache
                pltpu.VMEM((STN_C2, 128), jnp.float32),  # STN lane-dense running max
            ],
        ),
        # "parallel" on the batch axis lets the runtime shard b across
        # TensorCores where supported; on v7x (2 TCs) switch this axis to
        # pltpu.CORE_PARALLEL if profiling shows b is not being split.
        compiler_params=pltpu.CompilerParams(
            dimension_semantics=("parallel", "arbitrary"),
            **compiler_kwargs),
        cost_estimate=pl.CostEstimate(
            flops=2 * B * N * (2 * STN_C1 + STN_C1 * STN_C2
                               + F * PTN_C1 + PTN_C1 * PTN_C2),
            transcendentals=0,
            bytes_accessed=(B * F * N * 4 + B * G * 4 + B * OUT * 4
                            + param_bytes)),
    )(x_f32, xg_col, params["pw"], params["pb"], params["hw"], params["hb"])

    return out_col.reshape(B, OUT)


def pointnet_forward(x, x_global, params, *, tile_n=4096,
                     memory_size=2 ** 16 - 1):
    """x: (1, B, F, N) f32, x_global: (1, B, G) f32 (PyTorch layout).

    Returns (B, out_features) f32.  x stays f32 in HBM and is read exactly
    once per point by the fused kernel (cast to bf16 on-chip).
    """
    x = jnp.squeeze(x, axis=0)
    x_global = jnp.squeeze(x_global, axis=0)
    B, _, N = x.shape

    # Choose a lane-dense tile and pad N up by edge replication (point-wise
    # convs + global max-pool are invariant to duplicated points).
    n128 = _round_up(N, 128)
    tile_req = max(128, (min(tile_n, n128) // 128) * 128)
    nt = -(-n128 // tile_req)
    tile_n = _round_up(-(-n128 // nt), 128)
    n_pad = nt * tile_n
    if n_pad != N:
        x = jnp.pad(x, ((0, 0), (0, 0), (0, n_pad - N)), mode="edge")

    num_chunks = -(-B // memory_size)            # host-side chunking, as in PyTorch
    outs = []
    for i in range(num_chunks):
        s, e = i * memory_size, min((i + 1) * memory_size, B)
        outs.append(_run_fused(x[s:e], x_global[s:e], params, tile_n))
    return jnp.concatenate(outs, axis=0)


# ---------------------------------------------------------------------------
# Pure-JAX reference (mirrors the kernel's bf16/f32 numerics exactly)
# ---------------------------------------------------------------------------

def pointnet_reference(x, x_global, params):
    x = jnp.squeeze(x, axis=0)
    xg = jnp.squeeze(x_global, axis=0)
    raw = params["raw"]
    outs = []
    for b in range(x.shape[0]):
        xt = x[b].astype(jnp.bfloat16)                          # (F, N)
        h2 = stn_point_features(xt[0:2, :], raw["stn_w1"], raw["stn_b1"],
                                raw["stn_w2"], raw["stn_b2"])
        pooled = jnp.max(h2, axis=-1, keepdims=True)
        tvec = stn_head_cm(pooled, raw["stn_w3"], raw["stn_b3"],
                           raw["stn_w4"], raw["stn_b4"],
                           raw["stn_wp_cm"], raw["stn_bp_eye_cm"])
        w1_eff = fold_transform_into_w1(raw["ptn_w1"], tvec)
        h2p = ptn_point_features(xt, w1_eff, raw["ptn_b1"],
                                 raw["ptn_w2"], raw["ptn_b2"])
        pooled_p = jnp.max(h2p, axis=-1, keepdims=True)
        w3 = raw["ptn_w3"]
        o = ptn_head(pooled_p, xg[b].reshape(-1, 1),
                     w3[:, :PTN_C2], w3[:, PTN_C2:], raw["ptn_b3"],
                     raw["ptn_w4"], raw["ptn_b4"],
                     raw["ptn_w5a"], raw["ptn_b5a"],
                     raw["ptn_w5b"], raw["ptn_b5b"])
        outs.append(o.reshape(1, -1))
    return jnp.concatenate(outs, axis=0)


if __name__ == "__main__":
    B, F, G, OUT, N = 4, 6, 7, 4, 512
    key = jax.random.PRNGKey(0)
    kx, kgl, kp = jax.random.split(key, 3)
    # PyTorch layouts: x (1, B, C, N), x_global (1, B, G)
    x = jax.random.normal(kx, (1, B, F, N), jnp.float32)
    x_global = jax.random.normal(kgl, (1, B, G), jnp.float32)
    params = make_params(kp, num_features=F, num_global_features=G,
                         out_features=OUT, k=2)

    ref = pointnet_reference(x, x_global, params)

    # tile_n=128 exercises the multi-tile (running-max + VMEM-cache replay)
    # path (nt=4); the default tile_n exercises the single-tile path (nt=1).
    out_tiled = jax.block_until_ready(
        pointnet_forward(x, x_global, params, tile_n=128))
    out_full = jax.block_until_ready(pointnet_forward(x, x_global, params))

    assert out_tiled.shape == (B, OUT), out_tiled.shape
    assert jnp.allclose(out_tiled, ref, atol=1e-2, rtol=1e-2), (out_tiled, ref)
    assert jnp.allclose(out_full, ref, atol=1e-2, rtol=1e-2), (out_full, ref)
    print("KERNEL_OK")
</pallas_src>

<mosaic_0001>
module attributes {stable_mosaic.version = 11 : i64} {
  func.func @_pointnet_fused_kernel(%arg0: i32, %arg1: i32, %arg2: memref<1x6x128xf32, #tpu.memory_space<vmem>>, %arg3: memref<1x7x1xf32, #tpu.memory_space<vmem>>, %arg4: memref<240x32xbf16, #tpu.memory_space<vmem>>, %arg5: memref<240x1xf32, #tpu.memory_space<vmem>>, %arg6: memref<168x135xf32, #tpu.memory_space<vmem>>, %arg7: memref<168x1xf32, #tpu.memory_space<vmem>>, %arg8: memref<1x4x1xf32, #tpu.memory_space<vmem>>, %arg9: memref<6x512xbf16, #tpu.memory_space<vmem>>, %arg10: memref<64x128xf32, #tpu.memory_space<vmem>>) attributes {dimension_semantics = [#tpu.dimension_semantics<parallel>, #tpu.dimension_semantics<arbitrary>], iteration_bounds = array<i64: 4, 4>, scalar_prefetch = 0 : i64, scratch_operands = 2 : i64, tpu.core_type = #tpu.core_type<tc>, window_params = [{transform_indices = @transform_0, window_bounds = array<i64: 1, 6, 128>}, {transform_indices = @transform_1, window_bounds = array<i64: 1, 7, 1>}, {pipeline_mode = #tpu.pipeline_mode<synchronous>, transform_indices = @transform_2, window_bounds = array<i64: 240, 32>}, {pipeline_mode = #tpu.pipeline_mode<synchronous>, transform_indices = @transform_3, window_bounds = array<i64: 240, 1>}, {pipeline_mode = #tpu.pipeline_mode<synchronous>, transform_indices = @transform_4, window_bounds = array<i64: 168, 135>}, {pipeline_mode = #tpu.pipeline_mode<synchronous>, transform_indices = @transform_5, window_bounds = array<i64: 168, 1>}, {transform_indices = @transform_6, window_bounds = array<i64: 1, 4, 1>}]} {
    %c0_i32 = arith.constant 0 : i32
    %0 = arith.cmpi eq, %arg1, %c0_i32 : i32
    %1 = arith.extui %0 : i1 to i32
    %c0_i32_0 = arith.constant 0 : i32
    %2 = arith.cmpi ne, %1, %c0_i32_0 : i32
    scf.if %2 {
      %cst_18 = arith.constant 0xFF800000 : f32
      %44 = vector.broadcast %cst_18 : f32 to vector<64x128xf32>
      %c0_19 = arith.constant 0 : index
      %c0_20 = arith.constant 0 : index
      %45 = vector.load %arg10[%c0_19, %c0_20] : memref<64x128xf32, #tpu.memory_space<vmem>>, vector<64x128xf32>
      tpu.vector_store %arg10[%c0_19, %c0_20], %44 {strides = array<i32>} : memref<64x128xf32, #tpu.memory_space<vmem>>, vector<64x128xf32>,
    } else {
    }
    %c0 = arith.constant 0 : index
    %c0_1 = arith.constant 0 : index
    %c0_2 = arith.constant 0 : index
    %3 = vector.load %arg2[%c0, %c0_1, %c0_2] : memref<1x6x128xf32, #tpu.memory_space<vmem>>, vector<1x6x128xf32>
    %4 = vector.shape_cast %3 : vector<1x6x128xf32> to vector<6x128xf32>
    %5 = arith.truncf %4 : vector<6x128xf32> to vector<6x128xbf16>
    %c128_i32 = arith.constant 128 : i32
    %6 = arith.muli %arg1, %c128_i32 : i32
    %7 = tpu.assume_multiple %6, 128 : i32
    %c0_3 = arith.constant 0 : index
    %8 = arith.index_cast %7 : i32 to index
    %9 = vector.load %arg9[%c0_3, %8] : memref<6x512xbf16, #tpu.memory_space<vmem>>, vector<6x128xbf16>
    tpu.vector_store %arg9[%c0_3, %8], %5 {strides = array<i32>} : memref<6x512xbf16, #tpu.memory_space<vmem>>, vector<6x128xbf16>,
    %c0_4 = arith.constant 0 : index
    %c0_5 = arith.constant 0 : index
    %10 = vector.load %arg4[%c0_4, %c0_5] : memref<240x32xbf16, #tpu.memory_space<vmem>>, vector<16x2xbf16>
    %c0_6 = arith.constant 0 : index
    %c0_7 = arith.constant 0 : index
    %11 = vector.load %arg5[%c0_6, %c0_7] : memref<240x1xf32, #tpu.memory_space<vmem>>, vector<16x1xf32>
    %c16 = arith.constant 16 : index
    %c0_8 = arith.constant 0 : index
    %12 = vector.load %arg4[%c16, %c0_8] : memref<240x32xbf16, #tpu.memory_space<vmem>>, vector<64x16xbf16>
    %c16_9 = arith.constant 16 : index
    %c0_10 = arith.constant 0 : index
    %13 = vector.load %arg5[%c16_9, %c0_10] : memref<240x1xf32, #tpu.memory_space<vmem>>, vector<64x1xf32>
    %14 = vector.extract_strided_slice %5 {offsets = [0, 0], sizes = [2, 128], strides = [1, 1]} : vector<6x128xbf16> to vector<2x128xbf16>
    %15 = arith.extf %14 : vector<2x128xbf16> to vector<2x128xf32>
    %16 = arith.extf %10 : vector<16x2xbf16> to vector<16x2xf32>
    %17 = vector.extract_strided_slice %16 {offsets = [0, 0], sizes = [16, 1], strides = [1, 1]} : vector<16x2xf32> to vector<16x1xf32>
    %18 = vector.extract_strided_slice %15 {offsets = [0, 0], sizes = [1, 128], strides = [1, 1]} : vector<2x128xf32> to vector<1x128xf32>
    %19 = vector.broadcast %17 : vector<16x1xf32> to vector<16x128xf32>
    %20 = vector.broadcast %18 : vector<1x128xf32> to vector<16x128xf32>
    %21 = arith.mulf %19, %20 : vector<16x128xf32>
    %22 = vector.extract_strided_slice %16 {offsets = [0, 1], sizes = [16, 1], strides = [1, 1]} : vector<16x2xf32> to vector<16x1xf32>
    %23 = vector.extract_strided_slice %15 {offsets = [1, 0], sizes = [1, 128], strides = [1, 1]} : vector<2x128xf32> to vector<1x128xf32>
    %24 = vector.broadcast %22 : vector<16x1xf32> to vector<16x128xf32>
    %25 = vector.broadcast %23 : vector<1x128xf32> to vector<16x128xf32>
    %26 = arith.mulf %24, %25 : vector<16x128xf32>
    %27 = arith.addf %21, %26 : vector<16x128xf32>
    %28 = vector.broadcast %11 : vector<16x1xf32> to vector<16x128xf32>
    %29 = arith.addf %27, %28 : vector<16x128xf32>
    %cst = arith.constant 0.000000e+00 : f32
    %30 = vector.broadcast %cst : f32 to vector<16x128xf32>
    %31 = arith.maximumf %29, %30 : vector<16x128xf32>
    %32 = arith.truncf %31 : vector<16x128xf32> to vector<16x128xbf16>
    %cst_11 = arith.constant dense<0.000000e+00> : vector<64x128xf32>
    %33 = tpu.matmul %12, %32, %cst_11 {dimension_numbers = #tpu.dot_dimension_numbers<[1], [0], [0], [1], [0, 0, 1, 1], [], []>} : vector<64x16xbf16>, vector<16x128xbf16>, vector<64x128xf32> -> vector<64x128xf32>
    %34 = vector.broadcast %13 : vector<64x1xf32> to vector<64x128xf32>
    %35 = arith.addf %33, %34 : vector<64x128xf32>
    %cst_12 = arith.constant 0.000000e+00 : f32
    %36 = vector.broadcast %cst_12 : f32 to vector<64x128xf32>
    %37 = arith.maximumf %35, %36 : vector<64x128xf32>
    %c0_13 = arith.constant 0 : index
    %c0_14 = arith.constant 0 : index
    %38 = vector.load %arg10[%c0_13, %c0_14] : memref<64x128xf32, #tpu.memory_space<vmem>>, vector<64x128xf32>
    %39 = arith.maximumf %38, %37 : vector<64x128xf32>
    %c0_15 = arith.constant 0 : index
    %c0_16 = arith.constant 0 : index
    %40 = vector.load %arg10[%c0_15, %c0_16] : memref<64x128xf32, #tpu.memory_space<vmem>>, vector<64x128xf32>
    tpu.vector_store %arg10[%c0_15, %c0_16], %39 {strides = array<i32>} : memref<64x128xf32, #tpu.memory_space<vmem>>, vector<64x128xf32>,
    %c3_i32 = arith.constant 3 : i32
    %41 = arith.cmpi eq, %arg1, %c3_i32 : i32
    %42 = arith.extui %41 : i1 to i32
    %c0_i32_17 = arith.constant 0 : i32
    %43 = arith.cmpi ne, %42, %c0_i32_17 : i32
    scf.if %43 {
      %c0_18 = arith.constant 0 : index
      %c0_19 = arith.constant 0 : index
      %44 = vector.load %arg10[%c0_18, %c0_19] : memref<64x128xf32, #tpu.memory_space<vmem>>, vector<64x128xf32>
      %cst_20 = arith.constant dense<0xFF800000> : vector<64xf32>
      %45 = vector.multi_reduction <maximumf>, %44, %cst_20 [1] : vector<64x128xf32> to vector<64xf32>
      %46 = vector.shape_cast %45 : vector<64xf32> to vector<64x1xf32>
      %c0_21 = arith.constant 0 : index
      %c0_22 = arith.constant 0 : index
      %47 = vector.load %arg6[%c0_21, %c0_22] : memref<168x135xf32, #tpu.memory_space<vmem>>, vector<32x64xf32>
      %c0_23 = arith.constant 0 : index
      %c0_24 = arith.constant 0 : index
      %48 = vector.load %arg7[%c0_23, %c0_24] : memref<168x1xf32, #tpu.memory_space<vmem>>, vector<32x1xf32>
      %c32 = arith.constant 32 : index
      %c0_25 = arith.constant 0 : index
      %49 = vector.load %arg6[%c32, %c0_25] : memref<168x135xf32, #tpu.memory_space<vmem>>, vector<16x32xf32>
      %c32_26 = arith.constant 32 : index
      %c0_27 = arith.constant 0 : index
      %50 = vector.load %arg7[%c32_26, %c0_27] : memref<168x1xf32, #tpu.memory_space<vmem>>, vector<16x1xf32>
      %c48 = arith.constant 48 : index
      %c0_28 = arith.constant 0 : index
      %51 = vector.load %arg6[%c48, %c0_28] : memref<168x135xf32, #tpu.memory_space<vmem>>, vector<4x16xf32>
      %c48_29 = arith.constant 48 : index
      %c0_30 = arith.constant 0 : index
      %52 = vector.load %arg7[%c48_29, %c0_30] : memref<168x1xf32, #tpu.memory_space<vmem>>, vector<4x1xf32>
      %cst_31 = arith.constant dense<0.000000e+00> : vector<32x1xf32>
      %53 = tpu.matmul %47, %46, %cst_31 {dimension_numbers = #tpu.dot_dimension_numbers<[1], [0], [0], [1], [0, 0, 1, 1], [], []>} : vector<32x64xf32>, vector<64x1xf32>, vector<32x1xf32> -> vector<32x1xf32>
      %54 = arith.addf %53, %48 : vector<32x1xf32>
      %cst_32 = arith.constant 0.000000e+00 : f32
      %55 = vector.broadcast %cst_32 : f32 to vector<32x1xf32>
      %56 = arith.maximumf %54, %55 : vector<32x1xf32>
      %cst_33 = arith.constant dense<0.000000e+00> : vector<16x1xf32>
      %57 = tpu.matmul %49, %56, %cst_33 {dimension_numbers = #tpu.dot_dimension_numbers<[1], [0], [0], [1], [0, 0, 1, 1], [], []>} : vector<16x32xf32>, vector<32x1xf32>, vector<16x1xf32> -> vector<16x1xf32>
      %58 = arith.addf %57, %50 : vector<16x1xf32>
      %cst_34 = arith.constant 0.000000e+00 : f32
      %59 = vector.broadcast %cst_34 : f32 to vector<16x1xf32>
      %60 = arith.maximumf %58, %59 : vector<16x1xf32>
      %cst_35 = arith.constant dense<0.000000e+00> : vector<4x1xf32>
      %61 = tpu.matmul %51, %60, %cst_35 {dimension_numbers = #tpu.dot_dimension_numbers<[1], [0], [0], [1], [0, 0, 1, 1], [], []>} : vector<4x16xf32>, vector<16x1xf32>, vector<4x1xf32> -> vector<4x1xf32>
      %62 = arith.addf %61, %52 : vector<4x1xf32>
      %c80 = arith.constant 80 : index
      %c0_36 = arith.constant 0 : index
      %63 = vector.load %arg4[%c80, %c0_36] : memref<240x32xbf16, #tpu.memory_space<vmem>>, vector<32x6xbf16>
      %c80_37 = arith.constant 80 : index
      %c0_38 = arith.constant 0 : index
      %64 = vector.load %arg5[%c80_37, %c0_38] : memref<240x1xf32, #tpu.memory_space<vmem>>, vector<32x1xf32>
      %c112 = arith.constant 112 : index
      %c0_39 = arith.constant 0 : index
      %65 = vector.load %arg4[%c112, %c0_39] : memref<240x32xbf16, #tpu.memory_space<vmem>>, vector<128x32xbf16>
      %c112_40 = arith.constant 112 : index
      %c0_41 = arith.constant 0 : index
      %66 = vector.load %arg5[%c112_40, %c0_41] : memref<240x1xf32, #tpu.memory_space<vmem>>, vector<128x1xf32>
      %67 = arith.extf %63 : vector<32x6xbf16> to vector<32x6xf32>
      %68 = vector.extract_strided_slice %67 {offsets = [0, 0], sizes = [32, 2], strides = [1, 1]} : vector<32x6xf32> to vector<32x2xf32>
      %69 = vector.extract_strided_slice %62 {offsets = [0, 0], sizes = [2, 1], strides = [1, 1]} : vector<4x1xf32> to vector<2x1xf32>
      %cst_42 = arith.constant dense<0.000000e+00> : vector<32x1xf32>
      %70 = tpu.matmul %68, %69, %cst_42 {dimension_numbers = #tpu.dot_dimension_numbers<[1], [0], [0], [1], [0, 0, 1, 1], [], []>} : vector<32x2xf32>, vector<2x1xf32>, vector<32x1xf32> -> vector<32x1xf32>
      %71 = vector.extract_strided_slice %62 {offsets = [2, 0], sizes = [2, 1], strides = [1, 1]} : vector<4x1xf32> to vector<2x1xf32>
      %cst_43 = arith.constant dense<0.000000e+00> : vector<32x1xf32>
      %72 = tpu.matmul %68, %71, %cst_43 {dimension_numbers = #tpu.dot_dimension_numbers<[1], [0], [0], [1], [0, 0, 1, 1], [], []>} : vector<32x2xf32>, vector<2x1xf32>, vector<32x1xf32> -> vector<32x1xf32>
      %73 = vector.extract_strided_slice %67 {offsets = [0, 2], sizes = [32, 4], strides = [1, 1]} : vector<32x6xf32> to vector<32x4xf32>
      %74 = tpu.concatenate %70, %72, %73 in 1 : vector<32x1xf32>, vector<32x1xf32>, vector<32x4xf32> -> vector<32x6xf32>
      %75 = arith.truncf %74 : vector<32x6xf32> to vector<32x6xbf16>
      %cst_44 = arith.constant 0xFF800000 : f32
      %76 = vector.broadcast %cst_44 : f32 to vector<128x128xf32>
      %c0_i32_45 = arith.constant 0 : i32
      %c128_i32_46 = arith.constant 128 : i32
      %77 = arith.muli %c0_i32_45, %c128_i32_46 : i32
      %78 = tpu.assume_multiple %77, 128 : i32
      %c0_47 = arith.constant 0 : index
      %79 = arith.index_cast %78 : i32 to index
      %80 = vector.load %arg9[%c0_47, %79] : memref<6x512xbf16, #tpu.memory_space<vmem>>, vector<6x128xbf16>
      %cst_48 = arith.constant dense<0.000000e+00> : vector<32x128xf32>
      %81 = tpu.matmul %75, %80, %cst_48 {dimension_numbers = #tpu.dot_dimension_numbers<[1], [0], [0], [1], [0, 0, 1, 1], [], []>} : vector<32x6xbf16>, vector<6x128xbf16>, vector<32x128xf32> -> vector<32x128xf32>
      %82 = vector.broadcast %64 : vector<32x1xf32> to vector<32x128xf32>
      %83 = arith.addf %81, %82 : vector<32x128xf32>
      %cst_49 = arith.constant 0.000000e+00 : f32
      %84 = vector.broadcast %cst_49 : f32 to vector<32x128xf32>
      %85 = arith.maximumf %83, %84 : vector<32x128xf32>
      %86 = arith.truncf %85 : vector<32x128xf32> to vector<32x128xbf16>
      %cst_50 = arith.constant dense<0.000000e+00> : vector<128x128xf32>
      %87 = tpu.matmul %65, %86, %cst_50 {dimension_numbers = #tpu.dot_dimension_numbers<[1], [0], [0], [1], [0, 0, 1, 1], [], []>} : vector<128x32xbf16>, vector<32x128xbf16>, vector<128x128xf32> -> vector<128x128xf32>
      %88 = vector.broadcast %66 : vector<128x1xf32> to vector<128x128xf32>
      %89 = arith.addf %87, %88 : vector<128x128xf32>
      %cst_51 = arith.constant 0.000000e+00 : f32
      %90 = vector.broadcast %cst_51 : f32 to vector<128x128xf32>
      %91 = arith.maximumf %89, %90 : vector<128x128xf32>
      %92 = arith.maximumf %76, %91 : vector<128x128xf32>
      %c1_i32 = arith.constant 1 : i32
      %c128_i32_52 = arith.constant 128 : i32
      %93 = arith.muli %c1_i32, %c128_i32_52 : i32
      %94 = tpu.assume_multiple %93, 128 : i32
      %c0_53 = arith.constant 0 : index
      %95 = arith.index_cast %94 : i32 to index
      %96 = vector.load %arg9[%c0_53, %95] : memref<6x512xbf16, #tpu.memory_space<vmem>>, vector<6x128xbf16>
      %cst_54 = arith.constant dense<0.000000e+00> : vector<32x128xf32>
      %97 = tpu.matmul %75, %96, %cst_54 {dimension_numbers = #tpu.dot_dimension_numbers<[1], [0], [0], [1], [0, 0, 1, 1], [], []>} : vector<32x6xbf16>, vector<6x128xbf16>, vector<32x128xf32> -> vector<32x128xf32>
      %98 = vector.broadcast %64 : vector<32x1xf32> to vector<32x128xf32>
      %99 = arith.addf %97, %98 : vector<32x128xf32>
      %cst_55 = arith.constant 0.000000e+00 : f32
      %100 = vector.broadcast %cst_55 : f32 to vector<32x128xf32>
      %101 = arith.maximumf %99, %100 : vector<32x128xf32>
      %102 = arith.truncf %101 : vector<32x128xf32> to vector<32x128xbf16>
      %cst_56 = arith.constant dense<0.000000e+00> : vector<128x128xf32>
      %103 = tpu.matmul %65, %102, %cst_56 {dimension_numbers = #tpu.dot_dimension_numbers<[1], [0], [0], [1], [0, 0, 1, 1], [], []>} : vector<128x32xbf16>, vector<32x128xbf16>, vector<128x128xf32> -> vector<128x128xf32>
      %104 = vector.broadcast %66 : vector<128x1xf32> to vector<128x128xf32>
      %105 = arith.addf %103, %104 : vector<128x128xf32>
      %cst_57 = arith.constant 0.000000e+00 : f32
      %106 = vector.broadcast %cst_57 : f32 to vector<128x128xf32>
      %107 = arith.maximumf %105, %106 : vector<128x128xf32>
      %108 = arith.maximumf %92, %107 : vector<128x128xf32>
      %c2_i32 = arith.constant 2 : i32
      %c128_i32_58 = arith.constant 128 : i32
      %109 = arith.muli %c2_i32, %c128_i32_58 : i32
      %110 = tpu.assume_multiple %109, 128 : i32
      %c0_59 = arith.constant 0 : index
      %111 = arith.index_cast %110 : i32 to index
      %112 = vector.load %arg9[%c0_59, %111] : memref<6x512xbf16, #tpu.memory_space<vmem>>, vector<6x128xbf16>
      %cst_60 = arith.constant dense<0.000000e+00> : vector<32x128xf32>
      %113 = tpu.matmul %75, %112, %cst_60 {dimension_numbers = #tpu.dot_dimension_numbers<[1], [0], [0], [1], [0, 0, 1, 1], [], []>} : vector<32x6xbf16>, vector<6x128xbf16>, vector<32x128xf32> -> vector<32x128xf32>
      %114 = vector.broadcast %64 : vector<32x1xf32> to vector<32x128xf32>
      %115 = arith.addf %113, %114 : vector<32x128xf32>
      %cst_61 = arith.constant 0.000000e+00 : f32
      %116 = vector.broadcast %cst_61 : f32 to vector<32x128xf32>
      %117 = arith.maximumf %115, %116 : vector<32x128xf32>
      %118 = arith.truncf %117 : vector<32x128xf32> to vector<32x128xbf16>
      %cst_62 = arith.constant dense<0.000000e+00> : vector<128x128xf32>
      %119 = tpu.matmul %65, %118, %cst_62 {dimension_numbers = #tpu.dot_dimension_numbers<[1], [0], [0], [1], [0, 0, 1, 1], [], []>} : vector<128x32xbf16>, vector<32x128xbf16>, vector<128x128xf32> -> vector<128x128xf32>
      %120 = vector.broadcast %66 : vector<128x1xf32> to vector<128x128xf32>
      %121 = arith.addf %119, %120 : vector<128x128xf32>
      %cst_63 = arith.constant 0.000000e+00 : f32
      %122 = vector.broadcast %cst_63 : f32 to vector<128x128xf32>
      %123 = arith.maximumf %121, %122 : vector<128x128xf32>
      %124 = arith.maximumf %108, %123 : vector<128x128xf32>
      %c3_i32_64 = arith.constant 3 : i32
      %c128_i32_65 = arith.constant 128 : i32
      %125 = arith.muli %c3_i32_64, %c128_i32_65 : i32
      %126 = tpu.assume_multiple %125, 128 : i32
      %c0_66 = arith.constant 0 : index
      %127 = arith.index_cast %126 : i32 to index
      %128 = vector.load %arg9[%c0_66, %127] : memref<6x512xbf16, #tpu.memory_space<vmem>>, vector<6x128xbf16>
      %cst_67 = arith.constant dense<0.000000e+00> : vector<32x128xf32>
      %129 = tpu.matmul %75, %128, %cst_67 {dimension_numbers = #tpu.dot_dimension_numbers<[1], [0], [0], [1], [0, 0, 1, 1], [], []>} : vector<32x6xbf16>, vector<6x128xbf16>, vector<32x128xf32> -> vector<32x128xf32>
      %130 = vector.broadcast %64 : vector<32x1xf32> to vector<32x128xf32>
      %131 = arith.addf %129, %130 : vector<32x128xf32>
      %cst_68 = arith.constant 0.000000e+00 : f32
      %132 = vector.broadcast %cst_68 : f32 to vector<32x128xf32>
      %133 = arith.maximumf %131, %132 : vector<32x128xf32>
      %134 = arith.truncf %133 : vector<32x128xf32> to vector<32x128xbf16>
      %cst_69 = arith.constant dense<0.000000e+00> : vector<128x128xf32>
      %135 = tpu.matmul %65, %134, %cst_69 {dimension_numbers = #tpu.dot_dimension_numbers<[1], [0], [0], [1], [0, 0, 1, 1], [], []>} : vector<128x32xbf16>, vector<32x128xbf16>, vector<128x128xf32> -> vector<128x128xf32>
      %136 = vector.broadcast %66 : vector<128x1xf32> to vector<128x128xf32>
      %137 = arith.addf %135, %136 : vector<128x128xf32>
      %cst_70 = arith.constant 0.000000e+00 : f32
      %138 = vector.broadcast %cst_70 : f32 to vector<128x128xf32>
      %139 = arith.maximumf %137, %138 : vector<128x128xf32>
      %140 = arith.maximumf %124, %139 : vector<128x128xf32>
      %c4_i32 = arith.constant 4 : i32
      %cst_71 = arith.constant dense<0xFF800000> : vector<128xf32>
      %141 = vector.multi_reduction <maximumf>, %140, %cst_71 [1] : vector<128x128xf32> to vector<128xf32>
      %142 = vector.shape_cast %141 : vector<128xf32> to vector<128x1xf32>
      %c0_72 = arith.constant 0 : index
      %c0_73 = arith.constant 0 : index
      %c0_74 = arith.constant 0 : index
      %143 = vector.load %arg3[%c0_72, %c0_73, %c0_74] : memref<1x7x1xf32, #tpu.memory_space<vmem>>, vector<1x7x1xf32>
      %144 = vector.shape_cast %143 : vector<1x7x1xf32> to vector<7x1xf32>
      %c56 = arith.constant 56 : index
      %c0_75 = arith.constant 0 : index
      %145 = vector.load %arg6[%c56, %c0_75] : memref<168x135xf32, #tpu.memory_space<vmem>>, vector<34x135xf32>
      %c56_76 = arith.constant 56 : index
      %c0_77 = arith.constant 0 : index
      %146 = vector.load %arg7[%c56_76, %c0_77] : memref<168x1xf32, #tpu.memory_space<vmem>>, vector<34x1xf32>
      %c96 = arith.constant 96 : index
      %c0_78 = arith.constant 0 : index
      %147 = vector.load %arg6[%c96, %c0_78] : memref<168x135xf32, #tpu.memory_space<vmem>>, vector<32x34xf32>
      %c96_79 = arith.constant 96 : index
      %c0_80 = arith.constant 0 : index
      %148 = vector.load %arg7[%c96_79, %c0_80] : memref<168x1xf32, #tpu.memory_space<vmem>>, vector<32x1xf32>
      %c128 = arith.constant 128 : index
      %c0_81 = arith.constant 0 : index
      %149 = vector.load %arg6[%c128, %c0_81] : memref<168x135xf32, #tpu.memory_space<vmem>>, vector<32x32xf32>
      %c128_82 = arith.constant 128 : index
      %c0_83 = arith.constant 0 : index
      %150 = vector.load %arg7[%c128_82, %c0_83] : memref<168x1xf32, #tpu.memory_space<vmem>>, vector<32x1xf32>
      %c160 = arith.constant 160 : index
      %c0_84 = arith.constant 0 : index
      %151 = vector.load %arg6[%c160, %c0_84] : memref<168x135xf32, #tpu.memory_space<vmem>>, vector<4x32xf32>
      %c160_85 = arith.constant 160 : index
      %c0_86 = arith.constant 0 : index
      %152 = vector.load %arg7[%c160_85, %c0_86] : memref<168x1xf32, #tpu.memory_space<vmem>>, vector<4x1xf32>
      %153 = vector.extract_strided_slice %145 {offsets = [0, 0], sizes = [34, 128], strides = [1, 1]} : vector<34x135xf32> to vector<34x128xf32>
      %154 = vector.extract_strided_slice %145 {offsets = [0, 128], sizes = [34, 7], strides = [1, 1]} : vector<34x135xf32> to vector<34x7xf32>
      %cst_87 = arith.constant dense<0.000000e+00> : vector<34x1xf32>
      %155 = tpu.matmul %153, %142, %cst_87 {dimension_numbers = #tpu.dot_dimension_numbers<[1], [0], [0], [1], [0, 0, 1, 1], [], []>} : vector<34x128xf32>, vector<128x1xf32>, vector<34x1xf32> -> vector<34x1xf32>
      %cst_88 = arith.constant dense<0.000000e+00> : vector<34x1xf32>
      %156 = tpu.matmul %154, %144, %cst_88 {dimension_numbers = #tpu.dot_dimension_numbers<[1], [0], [0], [1], [0, 0, 1, 1], [], []>} : vector<34x7xf32>, vector<7x1xf32>, vector<34x1xf32> -> vector<34x1xf32>
      %157 = arith.addf %155, %156 : vector<34x1xf32>
      %158 = arith.addf %157, %146 : vector<34x1xf32>
      %cst_89 = arith.constant 0.000000e+00 : f32
      %159 = vector.broadcast %cst_89 : f32 to vector<34x1xf32>
      %160 = arith.maximumf %158, %159 : vector<34x1xf32>
      %cst_90 = arith.constant dense<0.000000e+00> : vector<32x1xf32>
      %161 = tpu.matmul %147, %160, %cst_90 {dimension_numbers = #tpu.dot_dimension_numbers<[1], [0], [0], [1], [0, 0, 1, 1], [], []>} : vector<32x34xf32>, vector<34x1xf32>, vector<32x1xf32> -> vector<32x1xf32>
      %162 = arith.addf %161, %148 : vector<32x1xf32>
      %cst_91 = arith.constant 0.000000e+00 : f32
      %163 = vector.broadcast %cst_91 : f32 to vector<32x1xf32>
      %164 = arith.maximumf %162, %163 : vector<32x1xf32>
      %cst_92 = arith.constant dense<0.000000e+00> : vector<32x1xf32>
      %165 = tpu.matmul %149, %164, %cst_92 {dimension_numbers = #tpu.dot_dimension_numbers<[1], [0], [0], [1], [0, 0, 1, 1], [], []>} : vector<32x32xf32>, vector<32x1xf32>, vector<32x1xf32> -> vector<32x1xf32>
      %166 = arith.addf %165, %150 : vector<32x1xf32>
      %cst_93 = arith.constant 0.000000e+00 : f32
      %167 = vector.broadcast %cst_93 : f32 to vector<32x1xf32>
      %168 = arith.maximumf %166, %167 : vector<32x1xf32>
      %cst_94 = arith.constant dense<0.000000e+00> : vector<4x1xf32>
      %169 = tpu.matmul %151, %168, %cst_94 {dimension_numbers = #tpu.dot_dimension_numbers<[1], [0], [0], [1], [0, 0, 1, 1], [], []>} : vector<4x32xf32>, vector<32x1xf32>, vector<4x1xf32> -> vector<4x1xf32>
      %170 = arith.addf %169, %152 : vector<4x1xf32>
      %171 = vector.shape_cast %170 : vector<4x1xf32> to vector<1x4x1xf32>
      %c0_95 = arith.constant 0 : index
      %c0_96 = arith.constant 0 : index
      %c0_97 = arith.constant 0 : index
      %172 = vector.load %arg8[%c0_95, %c0_96, %c0_97] : memref<1x4x1xf32, #tpu.memory_space<vmem>>, vector<1x4x1xf32>
      tpu.vector_store %arg8[%c0_95, %c0_96, %c0_97], %171 {strides = array<i32>} : memref<1x4x1xf32, #tpu.memory_space<vmem>>, vector<1x4x1xf32>,
    } else {
    }
    return
  }
  func.func @transform_0(%arg0: i32, %arg1: i32) -> (i32, i32, i32) {
    %c0_i32 = arith.constant 0 : i32
    %c0_i32_0 = arith.constant 0 : i32
    return %arg0, %c0_i32, %arg1 : i32, i32, i32
  }
  func.func @transform_1(%arg0: i32, %arg1: i32) -> (i32, i32, i32) {
    %c0_i32 = arith.constant 0 : i32
    %c0_i32_0 = arith.constant 0 : i32
    %c0_i32_1 = arith.constant 0 : i32
    return %arg0, %c0_i32, %c0_i32_0 : i32, i32, i32
  }
  func.func @transform_2(%arg0: i32, %arg1: i32) -> (i32, i32) {
    %c0_i32 = arith.constant 0 : i32
    %c0_i32_0 = arith.constant 0 : i32
    %c0_i32_1 = arith.constant 0 : i32
    return %c0_i32, %c0_i32_0 : i32, i32
  }
  func.func @transform_3(%arg0: i32, %arg1: i32) -> (i32, i32) {
    %c0_i32 = arith.constant 0 : i32
    %c0_i32_0 = arith.constant 0 : i32
    %c0_i32_1 = arith.constant 0 : i32
    return %c0_i32, %c0_i32_0 : i32, i32
  }
  func.func @transform_4(%arg0: i32, %arg1: i32) -> (i32, i32) {
    %c0_i32 = arith.constant 0 : i32
    %c0_i32_0 = arith.constant 0 : i32
    %c0_i32_1 = arith.constant 0 : i32
    return %c0_i32, %c0_i32_0 : i32, i32
  }
  func.func @transform_5(%arg0: i32, %arg1: i32) -> (i32, i32) {
    %c0_i32 = arith.constant 0 : i32
    %c0_i32_0 = arith.constant 0 : i32
    %c0_i32_1 = arith.constant 0 : i32
    return %c0_i32, %c0_i32_0 : i32, i32
  }
  func.func @transform_6(%arg0: i32, %arg1: i32) -> (i32, i32, i32) {
    %c0_i32 = arith.constant 0 : i32
    %c0_i32_0 = arith.constant 0 : i32
    %c0_i32_1 = arith.constant 0 : i32
    return %arg0, %c0_i32, %c0_i32_0 : i32, i32, i32
  }
}

</mosaic_0001>

<bundles_post_ra>
// kernel: tpu_custom_call.1
= control target key start
LH: loop header
LB: loop body
LE: loop exit
PB: predicated region body
PF: predicated region fallthrough
CT: control target
= control target key end

     0   :  { %s2085_s21 = smov 0   ;;  %s2087_s22 = smov 0   ;;  %s2676_s0 = inlined_call_operand.vmem [shape: f32[4,6,512], index: 0, kind: input, shape index: {}]   ;;  %s2677_s1 = inlined_call_operand.vmem [shape: f32[4,7,1], index: 1, kind: input, shape index: {}]   ;;  %s2678_s2 = inlined_call_operand.vmem [shape: bf16[240,32], index: 2, kind: input, shape index: {}]   ;;  %s2679_s3 = inlined_call_operand.vmem [shape: f32[240,1], index: 3, kind: input, shape index: {}]   ;;  %s2680_s4 = inlined_call_operand.vmem [shape: f32[168,135], index: 4, kind: input, shape index: {}]   ;;  %s2681_s5 = inlined_call_operand.vmem [shape: f32[168,1], index: 5, kind: input, shape index: {}]   ;;  %s2682_s6 = inlined_call_operand.vmem [shape: f32[4,4,1], index: 6, kind: output, shape index: {}]  }
   0x1   :  { %s2089_s23 = smov 0   ;;  %s2091_s24 = smov 0  }
   0x2   :  { %s2093_s25 = smov 0  }
   0x3 LB: > { %s25_s26 = sadd.s32 1, %s2035_s23  ;;  %s28_s27 = sadd.s32 1, %s2039_s24  ;;  %s2043_s25 = sphi %s2093_s25, %s16_s25   ;;  %s2039_s24 = sphi %s2091_s24, %s2686_s24   ;;  %s2035_s23 = sphi %s2089_s23, %s2685_s23   ;;  %s2031_s22 = sphi %s2087_s22, %s2684_s22   ;;  %s2027_s21 = sphi %s2085_s21, %s2683_s21  }
   0x4   : > { %p26_p0 = scmp.ge.s32.totalorder %s25_s26, 4  ;;  %p1767_p1 = scmp.ge.s32.totalorder %s2043_s25, 1 }
   0x5   : > { %p238_p2 = scmp.lt.s32.totalorder %s2043_s25, 17 }
   0x6   : > { %s2688_s26 = smov (%p26_p0, %s25_s26), 0  ;;  %s2690_s27 = smov (!%p26_p0, %s28_s27), %s2039_s24 }
   0x7   : > { %p239_p3 = pnand %p1767_p1, %p238_p2  ;;  %p30_p4 = scmp.ge.s32.totalorder %s2690_s27, 4 }
   0x8   : > { %p274_p5 = scmp.lt.s32.totalorder (!%p239_p3), %s2031_s22, 3  ;;  %p276_p6 = scmp.lt.s32.totalorder (!%p239_p3), %s2027_s21, 3 }
   0x9   : > { %s2692_s27 = smov (%p30_p4, %s2690_s27), 0  ;;  %242 = sbr.rel (%p239_p3) target bundleno = 2438 (0x986), region = 44 }
   0xa   : > { %p1772_p7 = scmp.ne.s32.totalorder (!%p239_p3), %s2027_s21, 0 }
   0xe   : > { %s2694_s22 = smov (!%p274_p5, %s2031_s22), 3 }
   0xf   : > { %s277_s28 = scalar_select %p276_p6, %s2027_s21, 3 }
  0x10   : > { %s1768_s29 = sshll.u32 %s2694_s22, 2  ;;  %s1770_s30 = sshll.u32 %s2694_s22, 3 }
  0x11   : > { %s279_s7 = sadd.s32 %s1768_s29, %s277_s28  ;;  %s2122_s10 = scalar_lea.vmem %s2677_s1, %s1770_s30 }
  0x12   : > { %s1769_s11 = sshll.u32 %s279_s7, 3  ;;  %s2127_s14 = scalar_lea.vmem %s2682_s6, %s1768_s29 }
  0x13   : > { %s2132_s17 = scalar_lea.vmem %s2676_s0, %s1769_s11  ;;  %294 = sbr.rel (%p1772_p7) target bundleno = 33 (0x21), region = 48 }
  0x18   : > { %v2045_v0 = vmov -inf  }
  0x19   : > { %295 = vst [vmem:[#allocation3 + $0x30] sm:$0xff] %v2045_v0 }
  0x1a   : > { %296 = vst [vmem:[#allocation3] sm:$0xff] %v2045_v0 }
  0x1b   : > { %297 = vst [vmem:[#allocation3 + $0x18] sm:$0xff] %v2045_v0 }
  0x1c   : > { %298 = vst [vmem:[#allocation3 + $0x10] sm:$0xff] %v2045_v0 }
  0x1d   : > { %299 = vst [vmem:[#allocation3 + $0x8] sm:$0xff] %v2045_v0 }
  0x1e   : > { %300 = vst [vmem:[#allocation3 + $0x20] sm:$0xff] %v2045_v0 }
  0x1f   : > { %301 = vst [vmem:[#allocation3 + $0x28] sm:$0xff] %v2045_v0 }
  0x20   : > { %302 = vst [vmem:[#allocation3 + $0x38] sm:$0xff] %v2045_v0 }
  0x21 PF: > { %v313_v1 = vld [vmem:[%s2679_s3] sm:$0xff]  ;;  %v2046_v3 = vmov 0   ;;  %v314_v7 = vld [vmem:[%s2679_s3 + $0x8] sm:$0xff]  ;;  %v2047_v8 = vmov 1   ;;  %v328_v10 = vld [vmem:[%s2679_s3 + $0x38] sm:$0xff]  ;;  %s1773_s13 = sshll.u32 %s2027_s21, 7 }
  0x22   : > { %v1916_v2 = vld [vmem:[%s2678_s2] sm:$0xff]   ;;  %1989 = vset.pattern.permute.xlu1 %v2046_v3  ;;  %1977 = vset.pattern.permute.xlu0 %v2046_v3  ;;  %v330_v11 = vld [vmem:[%s2679_s3 + $0x48] sm:$0xff]  ;;  %s306_s15 = sshra.s32 %s1773_s13, 7  ;;  %v323_v14 = vld [vmem:[%s2679_s3 + $0x10] sm:$0xff]  ;;  %vm435_vm0 = vcmask 130048   ;;  %p1795_p8 = scmp.ne.s32.totalorder %s2027_s21, 3 }
  0x23   : > { %v1917_v4 = vunpack.c.l.bf16 %v1916_v2  ;;  %v1918_v5 = vunpack.c.h.bf16 %v1916_v2  ;;  %362 = vperm.xlu1 %1989, %v313_v1   ;;  %1990 = vset.pattern.permute.xlu2 %v2046_v3  ;;  %v325_v9 = vld [vmem:[%s2679_s3 + $0x20] sm:$0xff]  ;;  %s1774_s16 = sshll.u32 %s306_s15, 2  ;;  %v327_v15 = vld [vmem:[%s2679_s3 + $0x30] sm:$0xff]  ;;  %v324_v17 = vld [vmem:[%s2679_s3 + $0x18] sm:$0xff]  ;;  %s2048_s19 = smov (!%p1795_p8), 1  }
  0x24   : > { %v303_v12 = vld [vmem:[%s2132_s17] sm:$0x3f]  ;;  %s309_s18 = scalar_lea.vmem [#allocation2], %s1774_s16  ;;  %377 = vperm.xlu2 %1990, %v323_v14   ;;  %v326_v24 = vld [vmem:[%s2679_s3 + $0x28] sm:$0xff]  ;;  %v1904_v42 = vld [vmem:[%s2678_s2 + $0x10] sm:$0xff] }
  0x25   : > { %v1978_v6 = vpack.i.bf16 %v1918_v5, %v1917_v4  ;;  %v304_v13 = vpack.c.bf16 %v303_v12, %v303_v12  ;;  %v329_v37 = vld [vmem:[%s2679_s3 + $0x40] sm:$0xff]  ;;  %v1903_v41 = vld [vmem:[%s2678_s2 + $0x8] sm:$0xff]  ;;  %v1905_v43 = vld [vmem:[%s2678_s2 + $0x18] sm:$0xff] }
  0x26   : > { %v1906_v44 = vld [vmem:[%s2678_s2 + $0x20] sm:$0xff]  ;;  %v487_v54 = vld [vmem:[#allocation3 + $0x18] sm:$0xff]  ;;  %v489_v4 = vld [vmem:[#allocation3 + $0x8] sm:$0xff] }
  0x27   : > { %1979 = vperm.xlu0 %1977, %v1978_v6   ;;  %310 = vst [vmem:[%s309_s18] sm:$0x7] %v304_v13  ;;  %v331_v18 = vunpack.c.l.bf16 %v304_v13  ;;  %v485_v53 = vld [vmem:[#allocation3 + $0x30] sm:$0xff]  ;;  %v491_v5 = vld [vmem:[#allocation3 + $0x28] sm:$0xff] }
  0x29   : > { %v344_v22 = vperm.slane %v331_v18, 0  ;;  %v355_v23 = vperm.slane %v331_v18, 1 }
  0x2b   : > { %367 = vperm.xlu1 %1989, %v314_v7  }
  0x2c   : > { %382 = vperm.xlu2 %1990, %v324_v17  }
  0x2f   : > { %1983 = vset.pattern.permute.xlu0 %v2047_v8 }
  0x30   : > { %1985 = vperm.xlu0 %1983, %v1978_v6  }
  0x33   : > { %387 = vperm.xlu1 %1989, %v325_v9  }
  0x34   : > { %392 = vperm.xlu2 %1990, %v326_v24   ;;  %v492_v24 = vld [vmem:[#allocation3 + $0x38] sm:$0xff] }
  0x38   : > { %1991 = vset.pattern.permute.xlu0 %v2046_v3 }
  0x39   : > { %397 = vperm.xlu0 %1991, %v327_v15  }
  0x3b   : > { %402 = vperm.xlu1 %1989, %v328_v10   ;;  %v486_v10 = vld [vmem:[#allocation3] sm:$0xff] }
  0x3c   : > { %407 = vperm.xlu2 %1990, %v329_v37  }
  0x43   : > { %412 = vperm.xlu1 %1989, %v330_v11   ;;  %v488_v11 = vld [vmem:[#allocation3 + $0x10] sm:$0xff] }
  0x7e   : > { %v378_v45 = vpop.permute.xlu2 %377 }
  0x86   : > { %v383_v46 = vpop.permute.xlu2 %382 }
  0x8e   : > { %v393_v48 = vpop.permute.xlu2 %392 }
  0x95   : > { %v363_v19 = vpop.permute.xlu1 %362 }
  0x96   : > { %v408_v61 = vpop.permute.xlu2 %407 }
  0x99   : > { %v1980_v16 = vpop.permute.xlu0 %1979 }
  0x9a   : > { %v1982_v20 = vunpack.i.h.bf16 %v1980_v16  ;;  %v1981_v21 = vunpack.i.l.bf16 %v1980_v16 }
  0x9c   : > { %v345_v28 = vmul.f32 %v1981_v21, %v344_v22  ;;  %v346_v29 = vmul.f32 %v1982_v20, %v344_v22 }
  0x9d   : > { %v368_v34 = vpop.permute.xlu1 %367 }
  0xa2   : > { %v1986_v25 = vpop.permute.xlu0 %1985 }
  0xa3   : > { %v1988_v26 = vunpack.i.h.bf16 %v1986_v25  ;;  %v1987_v27 = vunpack.i.l.bf16 %v1986_v25 }
  0xa5   : > { %v356_v30 = vmul.f32 %v1987_v27, %v355_v23  ;;  %v357_v31 = vmul.f32 %v1988_v26, %v355_v23  ;;  %v388_v47 = vpop.permute.xlu1 %387  ;;  %v490_v23 = vld [vmem:[#allocation3 + $0x20] sm:$0xff] }
  0xa7   : > { %v358_v32 = vadd.f32 %v356_v30, %v345_v28  ;;  %v359_v33 = vadd.f32 %v357_v31, %v346_v29 }
  0xa9   : > { %v370_v35 = vadd.f32 %v363_v19, %v358_v32  ;;  %v371_v36 = vadd.f32 %v368_v34, %v359_v33 }
  0xab   : > { %v372_v38 = vmax.f32 %v370_v35, 0.0  ;;  %v373_v39 = vmax.f32 %v371_v36, 0.0  ;;  %v398_v60 = vpop.permute.xlu0 %397 }
  0xad   : > { %v374_v40 = vpack.c.bf16 %v373_v39, %v372_v38  ;;  %v403_v57 = vpop.permute.xlu1 %402 }
  0xaf   : > { %455 = vmatpush.bf16.msra.mxu0 %v374_v40  ;;  %1929 = vmatpush.bf16.msra.mxu1 %v374_v40 }
  0xb0   : > { %1930 = vmatpush.bf16.msra.mxu2 %v374_v40  ;;  %1931 = vmatpush.bf16.msra.mxu3 %v374_v40 }
  0xb2   : > { %1791 = vmatmul.msk.bf16.vlgmr.msra.gmra.mxu0 %vm435_vm0, %v1903_v41  ;;  %1792 = vmatmul.msk.bf16.vlgmr.msra.gmra.mxu1 %vm435_vm0, %v1904_v42 }
  0xb3   : > { %1793 = vmatmul.msk.bf16.vlgmr.msra.gmra.mxu2 %vm435_vm0, %v1905_v43  ;;  %1794 = vmatmul.msk.bf16.vlgmr.msra.gmra.mxu3 %vm435_vm0, %v1906_v44 }
  0xb5   : > { %v413_v18 = vpop.permute.xlu1 %412 }
 0x12f   : > { %v457_v49 = vpop.f32.mrf.mxu0  ;;  %v462_v50 = vpop.f32.mrf.mxu1 }
 0x130   : > { %v458_v51 = vadd.f32 %v457_v49, %v378_v45  ;;  %v463_v52 = vadd.f32 %v462_v50, %v388_v47 }
 0x132   : > { %v477_v55 = vmax.f32 %v458_v51, 0.0  ;;  %v479_v56 = vmax.f32 %v463_v52, 0.0 }
 0x134   : > { %v493_v58 = vmax.f32 %v485_v53, %v477_v55  ;;  %v495_v59 = vmax.f32 %v487_v54, %v479_v56 }
 0x136   : > { %501 = vst [vmem:[#allocation3 + $0x30] sm:$0xff] %v493_v58  ;;  %v467_v62 = vpop.f32.mrf.mxu2  ;;  %v472_v63 = vpop.f32.mrf.mxu3 }
 0x137   : > { %503 = vst [vmem:[#allocation3 + $0x18] sm:$0xff] %v495_v59  ;;  %v468_v0 = vadd.f32 %v467_v62, %v398_v60  ;;  %v473_v1 = vadd.f32 %v472_v63, %v408_v61  ;;  %v459_v2 = vpop.f32.mrf.mxu0  ;;  %v464_v3 = vpop.f32.mrf.mxu1 }
 0x138   : > { %v460_v6 = vadd.f32 %v459_v2, %v383_v46  ;;  %v465_v7 = vadd.f32 %v464_v3, %v393_v48 }
 0x139   : > { %v481_v8 = vmax.f32 %v468_v0, 0.0  ;;  %v483_v9 = vmax.f32 %v473_v1, 0.0 }
 0x13a   : > { %v478_v12 = vmax.f32 %v460_v6, 0.0  ;;  %v480_v13 = vmax.f32 %v465_v7, 0.0 }
 0x13b   : > { %v497_v14 = vmax.f32 %v489_v4, %v481_v8  ;;  %v499_v15 = vmax.f32 %v491_v5, %v483_v9 }
 0x13c   : > { %v494_v16 = vmax.f32 %v486_v10, %v478_v12  ;;  %v496_v17 = vmax.f32 %v488_v11, %v480_v13 }
 0x13d   : > { %505 = vst [vmem:[#allocation3 + $0x8] sm:$0xff] %v497_v14 }
 0x13e   : > { %507 = vst [vmem:[#allocation3 + $0x28] sm:$0xff] %v499_v15  ;;  %v469_v19 = vpop.f32.mrf.mxu2  ;;  %v474_v20 = vpop.f32.mrf.mxu3 }
 0x13f   : > { %502 = vst [vmem:[#allocation3] sm:$0xff] %v494_v16  ;;  %v470_v21 = vadd.f32 %v469_v19, %v403_v57  ;;  %v475_v22 = vadd.f32 %v474_v20, %v413_v18 }
 0x140   : > { %504 = vst [vmem:[#allocation3 + $0x10] sm:$0xff] %v496_v17 }
 0x141   : > { %v482_v25 = vmax.f32 %v470_v21, 0.0  ;;  %v484_v26 = vmax.f32 %v475_v22, 0.0 }
 0x142   : > { %512 = sbr.rel (%p1795_p8) target bundleno = 2438 (0x986), region = 52 }
 0x143   : > { %v498_v27 = vmax.f32 %v490_v23, %v482_v25  ;;  %v500_v28 = vmax.f32 %v492_v24, %v484_v26 }
 0x145   : > { %506 = vst [vmem:[#allocation3 + $0x20] sm:$0xff] %v498_v27 }
 0x146   : > { %508 = vst [vmem:[#allocation3 + $0x38] sm:$0xff] %v500_v28 }
 0x147   : > { %v516_v31 = vld [vmem:[#allocation3 + $0x10] sm:$0xff]  ;;  %v519_v32 = vld [vmem:[#allocation3 + $0x28] sm:$0xff]  ;;  %v515_v34 = vld [vmem:[#allocation3 + $0x18] sm:$0xff]  ;;  %vm551_vm1 = vcmask 523264   ;;  %vm597_vm2 = vcmask 261120   ;;  %vm709_vm3 = vcmask 1041408  }
 0x148   : > { %527 = vmax.xlane.f32.xlu2 %v516_v31  ;;  %v517_v33 = vld [vmem:[#allocation3 + $0x8] sm:$0xff]  ;;  %v514_v35 = vld [vmem:[#allocation3] sm:$0xff]  ;;  %v513_v36 = vld [vmem:[#allocation3 + $0x30] sm:$0xff]  ;;  %vm696_vm4 = vcmask 15360   ;;  %vm829_vm5 = vcmask 1042432   ;;  %vm790_vm6 = vcmask 7168  }
 0x149   : > { %v537_v45 = vld [vmem:[%s2680_s4] sm:$0xff]  ;;  %v538_v46 = vld [vmem:[%s2680_s4 + $0x10] sm:$0xff]  ;;  %v544_v53 = vld [vmem:[%s2681_s5 + $0x18] sm:$0xff]  ;;  %vm822_vm7 = vcmask 48128   ;;  %vm1482_vm8 = vcmask 1046528   ;;  %vm1466_vm9 = vcmask 56320  }
 0x14a   : > { %v539_v47 = vld [vmem:[%s2680_s4 + $0x20] sm:$0xff]  ;;  %v540_v48 = vld [vmem:[%s2680_s4 + $0x30] sm:$0xff]  ;;  %v542_v54 = vld [vmem:[%s2681_s5 + $0x8] sm:$0xff]  ;;  %vm1560_vm10 = vcmask 277504   ;;  %vm1677_vm11 = vcmask 3072  }
 0x14b   : > { %v543_v52 = vld [vmem:[%s2681_s5 + $0x10] sm:$0xff]  ;;  %v541_v58 = vld [vmem:[%s2681_s5] sm:$0xff]  ;;  %v548_v5 = vld [vmem:[%s2681_s5 + $0x28] sm:$0xff] }
 0x14c   : > { %v518_v30 = vld [vmem:[#allocation3 + $0x20] sm:$0xff]  ;;  %v545_v1 = vld [vmem:[%s2680_s4 + $0x40] sm:$0xff]  ;;  %v1927_v13 = vld [vmem:[%s2678_s2 + $0x28] sm:$0xff]  }
 0x14d   : > { %v520_v29 = vld [vmem:[#allocation3 + $0x38] sm:$0xff]  ;;  %531 = vmax.xlane.f32.xlu1 %v518_v30  ;;  %v546_v2 = vld [vmem:[%s2680_s4 + $0x50] sm:$0xff]  ;;  %v547_v4 = vld [vmem:[%s2681_s5 + $0x20] sm:$0xff]  ;;  %v1921_v16 = vunpack.c.l.bf16 %v1927_v13  ;;  %v1922_v18 = vunpack.c.h.bf16 %v1927_v13 }
 0x14e   : > { %535 = vmax.xlane.f32.xlu0 %v520_v29  ;;  %v549_v11 = vld [vmem:[%s2680_s4 + $0x60] sm:$0xf]  ;;  %v550_v12 = vld [vmem:[%s2681_s5 + $0x30] sm:$0xf]  ;;  %v1068_v29 = vld [vmem:[#allocation2 + $0x4] sm:$0x7] }
 0x14f   : > { %v1928_v19 = vld [vmem:[%s2678_s2 + $0x30] sm:$0xff]   ;;  %v801_v28 = vld [vmem:[#allocation2] sm:$0x7]  ;;  %v1070_v31 = vsel %vm829_vm5, %v1068_v29, 0 }
 0x150   : > { %525 = vmax.xlane.f32.xlu2 %v515_v34  ;;  %v1925_v20 = vunpack.c.l.bf16 %v1928_v19  ;;  %v1926_v21 = vunpack.c.h.bf16 %v1928_v19  ;;  %v831_v30 = vsel %vm829_vm5, %v801_v28, 0 }
 0x151   : > { %840 = vmatpush.bf16.msra.mxu1 %v831_v30 }
 0x155   : > { %529 = vmax.xlane.f32.xlu1 %v517_v33  ;;  %v2049_v33 = vmov 0  }
 0x156   : > { %533 = vmax.xlane.f32.xlu0 %v519_v32  ;;  %v656_v32 = vld [vmem:[%s2679_s3 + $0x50] sm:$0xff]  ;;  %2003 = vset.pattern.permute.xlu2 %v2049_v33 }
 0x157   : > { %2004 = vset.pattern.permute.xlu0 %v2049_v33  ;;  %2002 = vset.pattern.permute.xlu1 %v2049_v33 }
 0x15d   : > { %521 = vmax.xlane.f32.xlu1 %v513_v36 }
 0x15e   : > { %523 = vmax.xlane.f32.xlu0 %v514_v35 }
 0x1bb   : > { %v528_v39 = vpop.xlane.xlu2 %527 }
 0x1c0   : > { %v532_v38 = vpop.xlane.xlu1 %531 }
 0x1c1   : > { %v536_v37 = vpop.xlane.xlu0 %535 }
 0x1c2   : > { %572 = vmatpush.msra.mxu0 %v536_v37 }
 0x1c3   : > { %v526_v42 = vpop.xlane.xlu2 %525 }
 0x1c8   : > { %v530_v41 = vpop.xlane.xlu1 %529 }
 0x1c9   : > { %v534_v40 = vpop.xlane.xlu0 %533 }
 0x1ca   : > { %573 = vmatpush.msra.mxu0 %v534_v40 }
 0x1cc   : > { %574 = vmatpush.msra.mxu0 %v532_v38 }
 0x1ce   : > { %575 = vmatpush.msra.mxu0 %v530_v41 }
 0x1d0   : > { %576 = vmatpush.msra.mxu0 %v528_v39  ;;  %v522_v44 = vpop.xlane.xlu1 %521 }
 0x1d1   : > { %v524_v43 = vpop.xlane.xlu0 %523 }
 0x1d2   : > { %577 = vmatpush.msra.mxu0 %v526_v42 }
 0x1d4   : > { %578 = vmatpush.msra.mxu0 %v524_v43 }
 0x1d6   : > { %579 = vmatpush.msra.mxu0 %v522_v44  ;;  %v659_v44 = vld [vmem:[%s2679_s3 + $0x68] sm:$0xff] }
 0x1d7   : > { %1796 = vmatmul.msk.f32.vlgmr.msra.gmra.mxu0 %vm551_vm1, %v537_v45  ;;  %v657_v45 = vld [vmem:[%s2679_s3 + $0x58] sm:$0xff] }
 0x1df   : > { %1797 = vmatmul.msk.f32.gmra.mxu0 %vm551_vm1, %v538_v46  ;;  %v658_v46 = vld [vmem:[%s2679_s3 + $0x60] sm:$0xff] }
 0x1e0   : > { %814 = vperm.xlu1 %2002, %v658_v46  }
 0x1e7   : > { %1798 = vmatmul.msk.f32.gmra.mxu0 %vm551_vm1, %v539_v47  ;;  %v1179_v47 = vld [vmem:[#allocation2 + $0x8] sm:$0x7] }
 0x1ef   : > { %1799 = vmatmul.msk.f32.gmra.mxu0 %vm551_vm1, %v540_v48  ;;  %v1181_v48 = vsel %vm829_vm5, %v1179_v47, 0 }
 0x1f0   : > { %1190 = vmatpush.bf16.msrb.mxu1 %v1181_v48 }
 0x252   : > { %v815_v19 = vpop.permute.xlu1 %814 }
 0x254   : > { %v581_v49 = vpop.f32.mrf.mxu0 }
 0x255   : > { %v582_v61 = vadd.f32 %v581_v49, %v541_v58 }
 0x257   : > { %v593_v0 = vmax.f32 %v582_v61, 0.0  ;;  %v1290_v61 = vld [vmem:[#allocation2 + $0xc] sm:$0x7] }
 0x25c   : > { %v584_v50 = vpop.f32.mrf.mxu0 }
 0x25d   : > { %v585_v59 = vadd.f32 %v584_v50, %v542_v54 }
 0x25f   : > { %v594_v63 = vmax.f32 %v585_v59, 0.0  ;;  %v691_v59 = vld [vmem:[%s2679_s3 + $0xe8] sm:$0xff] }
 0x260   : > { %935 = vperm.xlu1 %2002, %v691_v59  }
 0x264   : > { %v587_v51 = vpop.f32.mrf.mxu0 }
 0x265   : > { %v588_v56 = vadd.f32 %v587_v51, %v543_v52 }
 0x267   : > { %v595_v62 = vmax.f32 %v588_v56, 0.0 }
 0x26c   : > { %v590_v55 = vpop.f32.mrf.mxu0 }
 0x26d   : > { %v591_v57 = vadd.f32 %v590_v55, %v544_v53 }
 0x26f   : > { %v596_v60 = vmax.f32 %v591_v57, 0.0 }
 0x271   : > { %616 = vmatpush.msrb.mxu0 %v596_v60  ;;  %v688_v60 = vld [vmem:[%s2679_s3 + $0xd0] sm:$0xff] }
 0x273   : > { %617 = vmatpush.msrb.mxu0 %v595_v62  ;;  %v1292_v62 = vsel %vm829_vm5, %v1290_v61, 0 }
 0x275   : > { %618 = vmatpush.msrb.mxu0 %v594_v63  ;;  %v689_v63 = vld [vmem:[%s2679_s3 + $0xd8] sm:$0xff] }
 0x276   : > { %925 = vperm.xlu1 %2002, %v689_v63  }
 0x277   : > { %619 = vmatpush.msrb.mxu0 %v593_v0  ;;  %v686_v0 = vld [vmem:[%s2679_s3 + $0xc0] sm:$0xff] }
 0x278   : > { %1800 = vmatmul.msk.f32.vlgmr.msrb.gmra.mxu0 %vm597_vm2, %v545_v1  ;;  %v685_v1 = vld [vmem:[%s2679_s3 + $0xb8] sm:$0xff] }
 0x27e   : > { %910 = vperm.xlu1 %2002, %v686_v0  }
 0x280   : > { %1801 = vmatmul.msk.f32.gmra.mxu0 %vm597_vm2, %v546_v2  ;;  %v690_v2 = vld [vmem:[%s2679_s3 + $0xe0] sm:$0xff] }
 0x2f5   : > { %v621_v3 = vpop.f32.mrf.mxu0 }
 0x2f6   : > { %v622_v7 = vadd.f32 %v621_v3, %v547_v4  ;;  %v683_v3 = vld [vmem:[%s2679_s3 + $0xa8] sm:$0xff]  ;;  %v682_v4 = vld [vmem:[%s2679_s3 + $0xa0] sm:$0xff] }
 0x2f7   : > { %895 = vperm.xlu1 %2002, %v683_v3  }
 0x2f8   : > { %v627_v10 = vmax.f32 %v622_v7, 0.0  ;;  %v679_v7 = vld [vmem:[%s2679_s3 + $0x88] sm:$0xff] }
 0x2fd   : > { %v624_v6 = vpop.f32.mrf.mxu0 }
 0x2fe   : > { %v625_v8 = vadd.f32 %v624_v6, %v548_v5  ;;  %v680_v5 = vld [vmem:[%s2679_s3 + $0x90] sm:$0xff]  ;;  %v687_v6 = vld [vmem:[%s2679_s3 + $0xc8] sm:$0xff] }
 0x2ff   : > { %880 = vperm.xlu1 %2002, %v680_v5  }
 0x300   : > { %v628_v9 = vmax.f32 %v625_v8, 0.0  ;;  %v677_v8 = vld [vmem:[%s2679_s3 + $0x78] sm:$0xff] }
 0x302   : > { %646 = vmatpush.msra.mxu2 %v628_v9  ;;  %v684_v9 = vld [vmem:[%s2679_s3 + $0xb0] sm:$0xff] }
 0x304   : > { %647 = vmatpush.msra.mxu2 %v627_v10  ;;  %v676_v10 = vld [vmem:[%s2679_s3 + $0x70] sm:$0xff] }
 0x305   : > { %1802 = vmatmul.msk.f32.vlgmr.msra.gmra.mxu2 %vm435_vm0, %v549_v11  ;;  %v681_v11 = vld [vmem:[%s2679_s3 + $0x98] sm:$0xff] }
 0x307   : > { %865 = vperm.xlu1 %2002, %v677_v8  }
 0x388   : > { %v649_v14 = vpop.f32.mrf.mxu2 }
 0x389   : > { %v650_v15 = vadd.f32 %v649_v14, %v550_v12  ;;  %v678_v12 = vld [vmem:[%s2679_s3 + $0x80] sm:$0xff] }
 0x38b   : > { %1803 = vmatpush.msk.msra.mxu3 %vm709_vm3, %v650_v15  ;;  %v742_v17 = vrot.slane %v650_v15, 2 }
 0x38c   : > { %1804 = vmatmul.msk.f32.vlgmr.msra.gmra.mxu3 %vm696_vm4, %v1921_v16 }
 0x38d   : > { %1808 = vmatpush.msk.msrb.mxu2 %vm709_vm3, %v742_v17 }
 0x38e   : > { %1809 = vmatmul.msk.f32.vlgmr.msrb.gmra.mxu2 %vm696_vm4, %v1921_v16 }
 0x38f   : > { %1079 = vmatpush.bf16.msra.mxu2 %v1070_v31 }
 0x394   : > { %1805 = vmatmul.msk.f32.gmra.mxu3 %vm696_vm4, %v1922_v18 }
 0x396   : > { %1810 = vmatmul.msk.f32.gmra.mxu2 %vm696_vm4, %v1922_v18 }
 0x39c   : > { %1806 = vmatmul.msk.f32.gmra.mxu3 %vm696_vm4, %v1925_v20 }
 0x39e   : > { %1811 = vmatmul.msk.f32.gmra.mxu2 %vm696_vm4, %v1925_v20 }
 0x3a4   : > { %1807 = vmatmul.msk.f32.gmra.mxu3 %vm696_vm4, %v1926_v21 }
 0x3a6   : > { %1812 = vmatmul.msk.f32.gmra.mxu2 %vm696_vm4, %v1926_v21 }
 0x40f   : > { %v730_v34 = vpop.f32.mrf.mxu3 }
 0x411   : > { %v762_v22 = vpop.f32.mrf.mxu2 }
 0x417   : > { %v733_v36 = vpop.f32.mrf.mxu3 }
 0x419   : > { %v765_v23 = vpop.f32.mrf.mxu2 }
 0x41a   : > { %v1992_v24 = vpack.i.bf16 %v765_v23, %v762_v22 }
 0x41c   : > { %1993 = vrot.lane.b32.xlu2 %v1992_v24, %s2048_s19 }
 0x41f   : > { %v736_v49 = vpop.f32.mrf.mxu3 }
 0x421   : > { %v768_v25 = vpop.f32.mrf.mxu2 }
 0x424   : > { %819 = vperm.xlu2 %2003, %v659_v44  }
 0x427   : > { %v739_v51 = vpop.f32.mrf.mxu3 }
 0x429   : > { %v771_v26 = vpop.f32.mrf.mxu2 }
 0x42a   : > { %v1997_v27 = vpack.i.bf16 %v771_v26, %v768_v25 }
 0x42c   : > { %1998 = vrot.lane.b32.xlu0 %v1997_v27, %s2048_s19  ;;  %809 = vperm.xlu2 %2003, %v657_v45  }
 0x434   : > { %804 = vperm.xlu0 %2004, %v656_v32   ;;  %930 = vperm.xlu2 %2003, %v690_v2  }
 0x43c   : > { %920 = vperm.xlu0 %2004, %v688_v60   ;;  %915 = vperm.xlu2 %2003, %v687_v6  }
 0x444   : > { %905 = vperm.xlu0 %2004, %v685_v1   ;;  %900 = vperm.xlu2 %2003, %v684_v9   ;;  %v1910_v1 = vld [vmem:[%s2678_s2 + $0x50] sm:$0xff] }
 0x44c   : > { %890 = vperm.xlu0 %2004, %v682_v4   ;;  %885 = vperm.xlu2 %2003, %v681_v11  }
 0x454   : > { %875 = vperm.xlu0 %2004, %v679_v7   ;;  %870 = vperm.xlu2 %2003, %v678_v12  }
 0x45c   : > { %860 = vperm.xlu0 %2004, %v676_v10  }
 0x476   : > { %v1994_v35 = vpop.permute.xlu2 %1993 }
 0x477   : > { %v1996_v37 = vunpack.i.h.bf16 %v1994_v35  ;;  %v1995_v38 = vunpack.i.l.bf16 %v1994_v35 }
 0x479   : > { %v791_v39 = vsel %vm790_vm6, %v730_v34, %v1995_v38  ;;  %v792_v40 = vsel %vm790_vm6, %v733_v36, %v1996_v37 }
 0x47a   : > { %v795_v41 = vsel %vm696_vm4, %v791_v39, %v1921_v16  ;;  %v796_v42 = vsel %vm696_vm4, %v792_v40, %v1922_v18 }
 0x47b   : > { %v799_v43 = vpack.c.bf16 %v796_v42, %v795_v41  ;;  %v1907_v42 = vld [vmem:[%s2678_s2 + $0x38] sm:$0xff] }
 0x47d   : > { %1813 = vmatmul.msk.bf16.vlgmr.msra.gmra.mxu1 %vm822_vm7, %v799_v43  ;;  %1855 = vmatmul.msk.bf16.vlgmr.msra.gmra.mxu2 %vm822_vm7, %v799_v43 }
 0x47e   : > { %1301 = vmatpush.bf16.msra.mxu1 %v1292_v62  ;;  %v2328_v16 = vpop.permute.xlu2 %819  ;;  %v1909_v62 = vld [vmem:[%s2678_s2 + $0x48] sm:$0xff] }
 0x49e   : > { %v1999_v50 = vpop.permute.xlu0 %1998 }
 0x49f   : > { %v2001_v52 = vunpack.i.h.bf16 %v1999_v50  ;;  %v2000_v53 = vunpack.i.l.bf16 %v1999_v50 }
 0x4a1   : > { %v793_v54 = vsel %vm790_vm6, %v736_v49, %v2000_v53  ;;  %v794_v55 = vsel %vm790_vm6, %v739_v51, %v2001_v52  ;;  %v1908_v49 = vld [vmem:[%s2678_s2 + $0x40] sm:$0xff] }
 0x4a2   : > { %v797_v56 = vsel %vm696_vm4, %v793_v54, %v1925_v20  ;;  %v798_v57 = vsel %vm696_vm4, %v794_v55, %v1926_v21  ;;  %v2330_v20 = vpop.permute.xlu2 %809 }
 0x4a3   : > { %v800_v58 = vpack.c.bf16 %v798_v57, %v797_v56 }
 0x4a5   : > { %1814 = vmatmul.msk.bf16.gmra.mxu1 %vm822_vm7, %v800_v58  ;;  %1856 = vmatmul.msk.bf16.gmra.mxu2 %vm822_vm7, %v800_v58 }
 0x4a6   : > { %v805_v23 = vpop.permute.xlu0 %804 }
 0x4b5   : > { %1865 = vmatmul.msk.bf16.vlgmr.msrb.gmra.mxu1 %vm822_vm7, %v799_v43 }
 0x4c5   : > { %1866 = vmatmul.msk.bf16.gmra.mxu1 %vm822_vm7, %v800_v58 }
 0x4d5   : > { %1875 = vmatmul.msk.bf16.vlgmr.msra.gmra.mxu1 %vm822_vm7, %v799_v43 }
 0x4e5   : > { %1876 = vmatmul.msk.bf16.gmra.mxu1 %vm822_vm7, %v800_v58 }
 0x4fa   : > { %v842_v13 = vpop.f32.mrf.mxu1 }
 0x4fb   : > { %v843_v27 = vadd.f32 %v842_v13, %v805_v23  ;;  %v1911_v13 = vld [vmem:[%s2678_s2 + $0x58] sm:$0xff] }
 0x4fd   : > { %v852_v34 = vmax.f32 %v843_v27, 0.0 }
 0x500   : > { %v1081_v14 = vpop.f32.mrf.mxu2 }
 0x501   : > { %v1082_v38 = vadd.f32 %v1081_v14, %v805_v23  ;;  %v1912_v14 = vld [vmem:[%s2678_s2 + $0x60] sm:$0xff] }
 0x502   : > { %v844_v15 = vpop.f32.mrf.mxu1 }
 0x503   : > { %v845_v25 = vadd.f32 %v844_v15, %v2330_v20  ;;  %v1091_v45 = vmax.f32 %v1082_v38, 0.0  ;;  %v2376_v15 = vpop.permute.xlu1 %935 }
 0x505   : > { %v853_v30 = vmax.f32 %v845_v25, 0.0 }
 0x507   : > { %v856_v41 = vpack.c.bf16 %v853_v30, %v852_v34 }
 0x508   : > { %v1083_v17 = vpop.f32.mrf.mxu2 }
 0x509   : > { %v1084_v35 = vadd.f32 %v1083_v17, %v2330_v20 }
 0x50b   : > { %v1092_v43 = vmax.f32 %v1084_v35, 0.0  ;;  %v2384_v17 = vpop.permute.xlu1 %925 }
 0x50d   : > { %v1095_v46 = vpack.c.bf16 %v1092_v43, %v1091_v45 }
 0x522   : > { %v847_v18 = vpop.f32.mrf.mxu1 }
 0x523   : > { %v848_v22 = vadd.f32 %v847_v18, %v815_v19  ;;  %v2387_v18 = vpop.permute.xlu2 %930 }
 0x525   : > { %v854_v29 = vmax.f32 %v848_v22, 0.0  ;;  %v2402_v22 = vpop.permute.xlu0 %920 }
 0x528   : > { %v1086_v21 = vpop.f32.mrf.mxu2 }
 0x529   : > { %v1087_v31 = vadd.f32 %v1086_v21, %v815_v19 }
 0x52a   : > { %v849_v24 = vpop.f32.mrf.mxu1 }
 0x52b   : > { %v850_v26 = vadd.f32 %v849_v24, %v2328_v16  ;;  %v1093_v39 = vmax.f32 %v1087_v31, 0.0  ;;  %v2400_v21 = vpop.permute.xlu2 %915 }
 0x52d   : > { %v855_v28 = vmax.f32 %v850_v26, 0.0  ;;  %v2410_v25 = vpop.permute.xlu0 %905 }
 0x52f   : > { %v857_v32 = vpack.c.bf16 %v855_v28, %v854_v29 }
 0x530   : > { %v1088_v33 = vpop.f32.mrf.mxu2 }
 0x531   : > { %v1089_v36 = vadd.f32 %v1088_v33, %v2328_v16  ;;  %1008 = vmatpush.bf16.msrb.mxu3 %v857_v32 }
 0x532   : > { %v1192_v37 = vpop.f32.mrf.mxu1 }
 0x533   : > { %v1094_v40 = vmax.f32 %v1089_v36, 0.0  ;;  %v1193_v54 = vadd.f32 %v1192_v37, %v805_v23  ;;  %v2408_v24 = vpop.permute.xlu2 %900 }
 0x535   : > { %v1096_v44 = vpack.c.bf16 %v1094_v40, %v1093_v39  ;;  %1009 = vmatpush.bf16.msrb.mxu3 %v856_v41  ;;  %v1202_v59 = vmax.f32 %v1193_v54, 0.0  ;;  %v2418_v30 = vpop.permute.xlu0 %890 }
 0x537   : > { %1103 = vmatpush.bf16.msra.mxu0 %v1096_v44 }
 0x538   : > { %1847 = vmatmul.msk.bf16.vlgmr.msrb.gmra.mxu3 %vm597_vm2, %v1907_v42 }
 0x53a   : > { %v1194_v47 = vpop.f32.mrf.mxu1 }
 0x53b   : > { %1104 = vmatpush.bf16.msra.mxu0 %v1095_v46  ;;  %v1195_v52 = vadd.f32 %v1194_v47, %v2330_v20  ;;  %v2416_v29 = vpop.permute.xlu2 %885 }
 0x53d   : > { %v1203_v57 = vmax.f32 %v1195_v52, 0.0 }
 0x53e   : > { %1857 = vmatmul.msk.bf16.vlgmr.msra.gmra.mxu0 %vm597_vm2, %v1907_v42 }
 0x53f   : > { %v1206_v61 = vpack.c.bf16 %v1203_v57, %v1202_v59 }
 0x542   : > { %v1197_v48 = vpop.f32.mrf.mxu1 }
 0x543   : > { %v1198_v50 = vadd.f32 %v1197_v48, %v815_v19  ;;  %v2427_v39 = vpop.permute.xlu2 %870 }
 0x545   : > { %v1204_v55 = vmax.f32 %v1198_v50, 0.0 }
 0x548   : > { %1848 = vmatmul.msk.bf16.gmra.mxu3 %vm597_vm2, %v1908_v49 }
 0x54a   : > { %v1199_v51 = vpop.f32.mrf.mxu1 }
 0x54b   : > { %v1200_v53 = vadd.f32 %v1199_v51, %v2328_v16 }
 0x54d   : > { %v1205_v56 = vmax.f32 %v1200_v53, 0.0 }
 0x54e   : > { %1858 = vmatmul.msk.bf16.gmra.mxu0 %vm597_vm2, %v1908_v49 }
 0x54f   : > { %v1207_v58 = vpack.c.bf16 %v1205_v56, %v1204_v55 }
 0x551   : > { %1214 = vmatpush.bf16.msrb.mxu2 %v1207_v58 }
 0x552   : > { %v1303_v60 = vpop.f32.mrf.mxu1 }
 0x553   : > { %v1304_v6 = vadd.f32 %v1303_v60, %v805_v23 }
 0x555   : > { %1215 = vmatpush.bf16.msrb.mxu2 %v1206_v61  ;;  %v1313_v11 = vmax.f32 %v1304_v6, 0.0 }
 0x558   : > { %1849 = vmatmul.msk.bf16.gmra.mxu3 %vm597_vm2, %v1909_v62  ;;  %1867 = vmatmul.msk.bf16.vlgmr.msrb.gmra.mxu2 %vm597_vm2, %v1907_v42 }
 0x55a   : > { %v1305_v63 = vpop.f32.mrf.mxu1 }
 0x55b   : > { %v1306_v4 = vadd.f32 %v1305_v63, %v2330_v20  ;;  %v2394_v20 = vld [vmem:[%s2678_s2 + $0x70] sm:$0xff] }
 0x55d   : > { %v1314_v9 = vmax.f32 %v1306_v4, 0.0 }
 0x55e   : > { %1859 = vmatmul.msk.bf16.gmra.mxu0 %vm597_vm2, %v1909_v62 }
 0x55f   : > { %v1317_v12 = vpack.c.bf16 %v1314_v9, %v1313_v11 }
 0x562   : > { %v1308_v0 = vpop.f32.mrf.mxu1 }
 0x563   : > { %v1309_v2 = vadd.f32 %v1308_v0, %v815_v19  ;;  %v2389_v19 = vpop.permute.xlu1 %910 }
 0x565   : > { %v1315_v7 = vmax.f32 %v1309_v2, 0.0 }
 0x568   : > { %1850 = vmatmul.msk.bf16.gmra.mxu3 %vm597_vm2, %v1910_v1  ;;  %1868 = vmatmul.msk.bf16.gmra.mxu2 %vm597_vm2, %v1908_v49 }
 0x56a   : > { %v1310_v3 = vpop.f32.mrf.mxu1 }
 0x56b   : > { %v1311_v5 = vadd.f32 %v1310_v3, %v2328_v16  ;;  %v1913_v16 = vld [vmem:[%s2678_s2 + $0x68] sm:$0xff]  ;;  %v2404_v23 = vpop.permute.xlu1 %895 }
 0x56d   : > { %v1316_v8 = vmax.f32 %v1311_v5, 0.0 }
 0x56e   : > { %1860 = vmatmul.msk.bf16.gmra.mxu0 %vm597_vm2, %v1910_v1 }
 0x56f   : > { %v1318_v10 = vpack.c.bf16 %v1316_v8, %v1315_v7 }
 0x571   : > { %1325 = vmatpush.bf16.msrb.mxu1 %v1318_v10 }
 0x573   : > { %v2412_v26 = vpop.permute.xlu1 %880 }
 0x575   : > { %1326 = vmatpush.bf16.msrb.mxu1 %v1317_v12 }
 0x578   : > { %1851 = vmatmul.msk.bf16.gmra.mxu3 %vm597_vm2, %v1911_v13  ;;  %1869 = vmatmul.msk.bf16.gmra.mxu2 %vm597_vm2, %v1909_v62 }
 0x579   : > { %1877 = vmatmul.msk.bf16.vlgmr.msrb.gmra.mxu1 %vm597_vm2, %v1907_v42  ;;  %v2429_v42 = vpop.permute.xlu0 %875 }
 0x57b   : > { %v2420_v31 = vpop.permute.xlu1 %865 }
 0x57e   : > { %1861 = vmatmul.msk.bf16.gmra.mxu0 %vm597_vm2, %v1911_v13 }
 0x581   : > { %v861_v52 = vpop.permute.xlu0 %860 }
 0x588   : > { %1852 = vmatmul.msk.bf16.gmra.mxu3 %vm597_vm2, %v1912_v14  ;;  %1870 = vmatmul.msk.bf16.gmra.mxu2 %vm597_vm2, %v1910_v1 }
 0x589   : > { %1878 = vmatmul.msk.bf16.gmra.mxu1 %vm597_vm2, %v1908_v49 }
 0x58e   : > { %1862 = vmatmul.msk.bf16.gmra.mxu0 %vm597_vm2, %v1912_v14 }
 0x598   : > { %1853 = vmatmul.msk.bf16.gmra.mxu3 %vm597_vm2, %v1913_v16  ;;  %1871 = vmatmul.msk.bf16.gmra.mxu2 %vm597_vm2, %v1911_v13 }
 0x599   : > { %1879 = vmatmul.msk.bf16.gmra.mxu1 %vm597_vm2, %v1909_v62 }
 0x59e   : > { %1863 = vmatmul.msk.bf16.gmra.mxu0 %vm597_vm2, %v1913_v16 }
 0x5a8   : > { %1854 = vmatmul.msk.bf16.gmra.mxu3 %vm597_vm2, %v2394_v20  ;;  %1872 = vmatmul.msk.bf16.gmra.mxu2 %vm597_vm2, %v1912_v14 }
 0x5a9   : > { %1880 = vmatmul.msk.bf16.gmra.mxu1 %vm597_vm2, %v1910_v1 }
 0x5ae   : > { %1864 = vmatmul.msk.bf16.gmra.mxu0 %vm597_vm2, %v2394_v20 }
 0x5b8   : > { %1873 = vmatmul.msk.bf16.gmra.mxu2 %vm597_vm2, %v1913_v16 }
 0x5b9   : > { %1881 = vmatmul.msk.bf16.gmra.mxu1 %vm597_vm2, %v1911_v13 }
 0x5bb   : > { %v1011_v27 = vpop.f32.mrf.mxu3  ;;  %v1106_v28 = vpop.f32.mrf.mxu0 }
 0x5bc   : > { %v1012_v55 = vadd.f32 %v1011_v27, %v861_v52  ;;  %v1107_v56 = vadd.f32 %v1106_v28, %v861_v52 }
 0x5be   : > { %v1051_v58 = vmax.f32 %v1012_v55, 0.0  ;;  %v1146_v59 = vmax.f32 %v1107_v56, 0.0 }
 0x5c0   : > { %v1162_v4 = vmax.f32 %v1051_v58, %v1146_v59 }
 0x5c3   : > { %v1013_v32 = vpop.f32.mrf.mxu3  ;;  %v1108_v33 = vpop.f32.mrf.mxu0 }
 0x5c4   : > { %v1014_v34 = vadd.f32 %v1013_v32, %v2420_v31  ;;  %v1109_v35 = vadd.f32 %v1108_v33, %v2420_v31 }
 0x5c6   : > { %v1052_v36 = vmax.f32 %v1014_v34, 0.0  ;;  %v1147_v37 = vmax.f32 %v1109_v35, 0.0 }
 0x5c8   : > { %v1163_v38 = vmax.f32 %v1052_v36, %v1147_v37  ;;  %1874 = vmatmul.msk.bf16.gmra.mxu2 %vm597_vm2, %v2394_v20 }
 0x5c9   : > { %1882 = vmatmul.msk.bf16.gmra.mxu1 %vm597_vm2, %v1912_v14 }
 0x5cb   : > { %v1016_v40 = vpop.f32.mrf.mxu3  ;;  %v1111_v41 = vpop.f32.mrf.mxu0 }
 0x5cc   : > { %v1017_v43 = vadd.f32 %v1016_v40, %v2427_v39  ;;  %v1112_v44 = vadd.f32 %v1111_v41, %v2427_v39 }
 0x5ce   : > { %v1053_v45 = vmax.f32 %v1017_v43, 0.0  ;;  %v1148_v46 = vmax.f32 %v1112_v44, 0.0 }
 0x5d0   : > { %v1164_v47 = vmax.f32 %v1053_v45, %v1148_v46 }
 0x5d3   : > { %v1018_v48 = vpop.f32.mrf.mxu3  ;;  %v1113_v49 = vpop.f32.mrf.mxu0 }
 0x5d4   : > { %v1019_v50 = vadd.f32 %v1018_v48, %v2429_v42  ;;  %v1114_v51 = vadd.f32 %v1113_v49, %v2429_v42 }
 0x5d6   : > { %v1054_v53 = vmax.f32 %v1019_v50, 0.0  ;;  %v1149_v54 = vmax.f32 %v1114_v51, 0.0 }
 0x5d8   : > { %v1165_v57 = vmax.f32 %v1054_v53, %v1149_v54 }
 0x5d9   : > { %1883 = vmatmul.msk.bf16.gmra.mxu1 %vm597_vm2, %v1913_v16 }
 0x5db   : > { %v1021_v60 = vpop.f32.mrf.mxu3  ;;  %v1116_v61 = vpop.f32.mrf.mxu0 }
 0x5dc   : > { %v1022_v62 = vadd.f32 %v1021_v60, %v2412_v26  ;;  %v1117_v63 = vadd.f32 %v1116_v61, %v2412_v26  ;;  %v1217_v0 = vpop.f32.mrf.mxu2 }
 0x5dd   : > { %v1218_v1 = vadd.f32 %v1217_v0, %v861_v52 }
 0x5de   : > { %v1055_v2 = vmax.f32 %v1022_v62, 0.0  ;;  %v1150_v3 = vmax.f32 %v1117_v63, 0.0 }
 0x5df   : > { %v1257_v5 = vmax.f32 %v1218_v1, 0.0 }
 0x5e0   : > { %v1166_v6 = vmax.f32 %v1055_v2, %v1150_v3 }
 0x5e1   : > { %v1273_v7 = vmax.f32 %v1162_v4, %v1257_v5 }
 0x5e3   : > { %v1023_v8 = vpop.f32.mrf.mxu3  ;;  %v1118_v9 = vpop.f32.mrf.mxu0 }
 0x5e4   : > { %v1024_v10 = vadd.f32 %v1023_v8, %v2416_v29  ;;  %v1119_v11 = vadd.f32 %v1118_v9, %v2416_v29  ;;  %v1219_v12 = vpop.f32.mrf.mxu2 }
 0x5e5   : > { %v1220_v13 = vadd.f32 %v1219_v12, %v2420_v31 }
 0x5e6   : > { %v1056_v14 = vmax.f32 %v1024_v10, 0.0  ;;  %v1151_v16 = vmax.f32 %v1119_v11, 0.0 }
 0x5e7   : > { %v1258_v27 = vmax.f32 %v1220_v13, 0.0 }
 0x5e8   : > { %v1167_v28 = vmax.f32 %v1056_v14, %v1151_v16 }
 0x5e9   : > { %v1274_v32 = vmax.f32 %v1163_v38, %v1258_v27  ;;  %1884 = vmatmul.msk.bf16.gmra.mxu1 %vm597_vm2, %v2394_v20 }
 0x5eb   : > { %v1026_v33 = vpop.f32.mrf.mxu3  ;;  %v1121_v34 = vpop.f32.mrf.mxu0 }
 0x5ec   : > { %v1027_v35 = vadd.f32 %v1026_v33, %v2418_v30  ;;  %v1122_v36 = vadd.f32 %v1121_v34, %v2418_v30  ;;  %v1222_v37 = vpop.f32.mrf.mxu2 }
 0x5ed   : > { %v1223_v40 = vadd.f32 %v1222_v37, %v2427_v39 }
 0x5ee   : > { %v1057_v41 = vmax.f32 %v1027_v35, 0.0  ;;  %v1152_v43 = vmax.f32 %v1122_v36, 0.0 }
 0x5ef   : > { %v1259_v44 = vmax.f32 %v1223_v40, 0.0 }
 0x5f0   : > { %v1168_v45 = vmax.f32 %v1057_v41, %v1152_v43 }
 0x5f1   : > { %v1275_v46 = vmax.f32 %v1164_v47, %v1259_v44 }
 0x5f3   : > { %v2459_v11 = vpop.f32.mrf.mxu3  ;;  %v2463_v13 = vpop.f32.mrf.mxu0 }
 0x5f4   : > { %v1224_v48 = vpop.f32.mrf.mxu2 }
 0x5f5   : > { %v1225_v38 = vadd.f32 %v1224_v48, %v2429_v42 }
 0x5f6   : > { %v1328_v49 = vpop.f32.mrf.mxu1 }
 0x5f7   : > { %v1260_v50 = vmax.f32 %v1225_v38, 0.0  ;;  %v1329_v20 = vadd.f32 %v1328_v49, %v861_v52 }
 0x5f9   : > { %v1276_v51 = vmax.f32 %v1165_v57, %v1260_v50  ;;  %v1368_v53 = vmax.f32 %v1329_v20, 0.0 }
 0x5fb   : > { %v2447_v54 = vmax.f32 %v1273_v7, %v1368_v53  ;;  %v2472_v33 = vpop.f32.mrf.mxu0 }
 0x5fc   : > { %v1227_v55 = vpop.f32.mrf.mxu2 }
 0x5fd   : > { %v1228_v56 = vadd.f32 %v1227_v55, %v2412_v26 }
 0x5fe   : > { %v1330_v58 = vpop.f32.mrf.mxu1 }
 0x5ff   : > { %v1261_v59 = vmax.f32 %v1228_v56, 0.0  ;;  %v1331_v60 = vadd.f32 %v1330_v58, %v2420_v31 }
 0x601   : > { %v1277_v61 = vmax.f32 %v1166_v6, %v1261_v59  ;;  %v1369_v62 = vmax.f32 %v1331_v60, 0.0 }
 0x603   : > { %v2451_v47 = vmax.f32 %v1274_v32, %v1369_v62  ;;  %v2470_v32 = vpop.f32.mrf.mxu3  ;;  %v2482_v43 = vpop.f32.mrf.mxu0 }
 0x604   : > { %v1229_v63 = vpop.f32.mrf.mxu2 }
 0x605   : > { %v1230_v0 = vadd.f32 %v1229_v63, %v2416_v29 }
 0x606   : > { %v1333_v1 = vpop.f32.mrf.mxu1 }
 0x607   : > { %v1262_v52 = vmax.f32 %v1230_v0, 0.0  ;;  %v1334_v57 = vadd.f32 %v1333_v1, %v2427_v39 }
 0x609   : > { %v1278_v2 = vmax.f32 %v1167_v28, %v1262_v52  ;;  %v1370_v3 = vmax.f32 %v1334_v57, 0.0 }
 0x60b   : > { %v2455_v4 = vmax.f32 %v1275_v46, %v1370_v3  ;;  %v2479_v41 = vpop.f32.mrf.mxu3  ;;  %v1131_v38 = vpop.f32.mrf.mxu0 }
 0x60c   : > { %v1232_v5 = vpop.f32.mrf.mxu2  ;;  %v1132_v56 = vadd.f32 %v1131_v38, %v2389_v19 }
 0x60d   : > { %v1233_v7 = vadd.f32 %v1232_v5, %v2418_v30 }
 0x60e   : > { %v1335_v8 = vpop.f32.mrf.mxu1  ;;  %v1156_v60 = vmax.f32 %v1132_v56, 0.0 }
 0x60f   : > { %v1263_v31 = vmax.f32 %v1233_v7, 0.0  ;;  %v1336_v6 = vadd.f32 %v1335_v8, %v2429_v42 }
 0x611   : > { %v1279_v9 = vmax.f32 %v1168_v45, %v1263_v31  ;;  %v1371_v10 = vmax.f32 %v1336_v6, 0.0 }
 0x613   : > { %v2461_v12 = vmax.f32 %v1276_v51, %v1371_v10  ;;  %v1133_v51 = vpop.f32.mrf.mxu0 }
 0x614   : > { %v2465_v39 = vpop.f32.mrf.mxu2  ;;  %v1134_v57 = vadd.f32 %v1133_v51, %v2400_v21 }
 0x616   : > { %v1338_v14 = vpop.f32.mrf.mxu1  ;;  %v1157_v6 = vmax.f32 %v1134_v57, 0.0 }
 0x617   : > { %v1339_v16 = vadd.f32 %v1338_v14, %v2412_v26 }
 0x619   : > { %v1372_v27 = vmax.f32 %v1339_v16, 0.0 }
 0x61b   : > { %v2468_v28 = vmax.f32 %v1277_v61, %v1372_v27  ;;  %v1136_v63 = vpop.f32.mrf.mxu0 }
 0x61c   : > { %v2475_v35 = vpop.f32.mrf.mxu2 }
 0x61e   : > { %v1340_v42 = vpop.f32.mrf.mxu1 }
 0x61f   : > { %v1341_v34 = vadd.f32 %v1340_v42, %v2416_v29  ;;  %v1036_v29 = vpop.f32.mrf.mxu3  ;;  %v1137_v42 = vadd.f32 %v1136_v63, %v2402_v22 }
 0x621   : > { %v1373_v36 = vmax.f32 %v1341_v34, 0.0 }
 0x623   : > { %v2477_v37 = vmax.f32 %v1278_v2, %v1373_v36 }
 0x624   : > { %v2484_v45 = vpop.f32.mrf.mxu2 }
 0x626   : > { %v1343_v40 = vpop.f32.mrf.mxu1 }
 0x627   : > { %v1344_v26 = vadd.f32 %v1343_v40, %v2418_v30  ;;  %v1038_v20 = vpop.f32.mrf.mxu3  ;;  %v1037_v30 = vadd.f32 %v1036_v29, %v2389_v19 }
 0x628   : > { %v1039_v52 = vadd.f32 %v1038_v20, %v2400_v21 }
 0x629   : > { %v1374_v44 = vmax.f32 %v1344_v26, 0.0  ;;  %v1061_v59 = vmax.f32 %v1037_v30, 0.0 }
 0x62a   : > { %v1062_v31 = vmax.f32 %v1039_v52, 0.0 }
 0x62b   : > { %v2486_v46 = vmax.f32 %v1279_v9, %v1374_v44  ;;  %v1172_v1 = vmax.f32 %v1061_v59, %v1156_v60 }
 0x62c   : > { %v1242_v49 = vpop.f32.mrf.mxu2  ;;  %v1173_v16 = vmax.f32 %v1062_v31, %v1157_v6 }
 0x62d   : > { %v1243_v58 = vadd.f32 %v1242_v49, %v2389_v19  ;;  %v1158_v49 = vmax.f32 %v1137_v42, 0.0 }
 0x62e   : > { %v2488_v48 = vpop.f32.mrf.mxu1 }
 0x62f   : > { %v1041_v61 = vpop.f32.mrf.mxu3  ;;  %v1267_v62 = vmax.f32 %v1243_v58, 0.0 }
 0x630   : > { %v1042_v27 = vadd.f32 %v1041_v61, %v2402_v22 }
 0x631   : > { %v1283_v5 = vmax.f32 %v1172_v1, %v1267_v62 }
 0x632   : > { %v1063_v38 = vmax.f32 %v1042_v27, 0.0 }
 0x634   : > { %v1244_v53 = vpop.f32.mrf.mxu2  ;;  %v1174_v30 = vmax.f32 %v1063_v38, %v1158_v49 }
 0x635   : > { %v1245_v7 = vadd.f32 %v1244_v53, %v2400_v21 }
 0x636   : > { %v2490_v50 = vpop.f32.mrf.mxu1 }
 0x637   : > { %v1268_v10 = vmax.f32 %v1245_v7, 0.0  ;;  %v1043_v36 = vpop.f32.mrf.mxu3 }
 0x638   : > { %v1044_v56 = vadd.f32 %v1043_v36, %v2384_v17 }
 0x639   : > { %v1284_v40 = vmax.f32 %v1173_v16, %v1268_v10 }
 0x63c   : > { %v1247_v3 = vpop.f32.mrf.mxu2 }
 0x63d   : > { %v1248_v26 = vadd.f32 %v1247_v3, %v2402_v22  ;;  %v1029_v3 = vadd.f32 %v2459_v11, %v2404_v23 }
 0x63e   : > { %v2492_v55 = vpop.f32.mrf.mxu1 }
 0x63f   : > { %v1269_v51 = vmax.f32 %v1248_v26, 0.0  ;;  %v1046_v62 = vpop.f32.mrf.mxu3  ;;  %v1058_v27 = vmax.f32 %v1029_v3, 0.0 }
 0x641   : > { %v1285_v59 = vmax.f32 %v1174_v30, %v1269_v51 }
 0x644   : > { %v1249_v29 = vpop.f32.mrf.mxu2 }
 0x645   : > { %v1250_v60 = vadd.f32 %v1249_v29, %v2384_v17  ;;  %v1127_v29 = vadd.f32 %v2472_v33, %v2408_v24 }
 0x646   : > { %v1353_v0 = vpop.f32.mrf.mxu1 }
 0x647   : > { %v1354_v2 = vadd.f32 %v1353_v0, %v2389_v19  ;;  %v1138_v19 = vpop.f32.mrf.mxu0  ;;  %v1064_v0 = vmax.f32 %v1044_v56, 0.0  ;;  %v1238_v56 = vadd.f32 %v2475_v35, %v2408_v24  ;;  %v1154_v33 = vmax.f32 %v1127_v29, 0.0  ;;  %v1433_v29 = vld [vmem:[%s2680_s4 + $0x70] sm:$0xff] }
 0x648   : > { %v1139_v58 = vadd.f32 %v1138_v19, %v2384_v17  ;;  %v1034_v35 = vadd.f32 %v2479_v41, %v2410_v25 }
 0x649   : > { %v1378_v8 = vmax.f32 %v1354_v2, 0.0  ;;  %v1270_v2 = vmax.f32 %v1250_v60, 0.0 }
 0x64a   : > { %v1159_v1 = vmax.f32 %v1139_v58, 0.0 }
 0x64b   : > { %v1394_v9 = vmax.f32 %v1283_v5, %v1378_v8  ;;  %v1124_v5 = vadd.f32 %v2463_v13, %v2404_v23  ;;  %v1047_v8 = vadd.f32 %v1046_v62, %v2387_v18  ;;  %v1346_v13 = vadd.f32 %v2488_v48, %v2404_v23 }
 0x64c   : > { %v1252_v57 = vpop.f32.mrf.mxu2 }
 0x64d   : > { %1420 = vmax.xlane.f32.xlu0 %v1394_v9  ;;  %v1235_v9 = vadd.f32 %v2465_v39, %v2404_v23  ;;  %v1153_v11 = vmax.f32 %v1124_v5, 0.0  ;;  %v1065_v42 = vmax.f32 %v1047_v8, 0.0  ;;  %v1032_v39 = vadd.f32 %v2470_v32, %v2408_v24 }
 0x64e   : > { %v1355_v14 = vpop.f32.mrf.mxu1  ;;  %v1375_v38 = vmax.f32 %v1346_v13, 0.0 }
 0x64f   : > { %v1356_v34 = vadd.f32 %v1355_v14, %v2400_v21  ;;  %v1141_v63 = vpop.f32.mrf.mxu0  ;;  %v1253_v14 = vadd.f32 %v1252_v57, %v2387_v18  ;;  %v1264_v19 = vmax.f32 %v1235_v9, 0.0  ;;  %v1351_v9 = vadd.f32 %v2492_v55, %v2410_v25 }
 0x650   : > { %v1142_v31 = vadd.f32 %v1141_v63, %v2387_v18  ;;  %v1349_v63 = vadd.f32 %v2490_v50, %v2408_v24  ;;  %v1240_v24 = vadd.f32 %v2484_v45, %v2410_v25 }
 0x651   : > { %v1379_v44 = vmax.f32 %v1356_v34, 0.0 }
 0x652   : > { %v1160_v34 = vmax.f32 %v1142_v31, 0.0  ;;  %v1376_v5 = vmax.f32 %v1349_v63, 0.0  ;;  %v1060_v31 = vmax.f32 %v1034_v35, 0.0 }
 0x653   : > { %v1395_v20 = vmax.f32 %v1284_v40, %v1379_v44  ;;  %v1048_v40 = vpop.f32.mrf.mxu3  ;;  %v1271_v44 = vmax.f32 %v1253_v14, 0.0  ;;  %v1266_v14 = vmax.f32 %v1240_v24, 0.0 }
 0x654   : > { %v1254_v49 = vpop.f32.mrf.mxu2  ;;  %v1176_v51 = vmax.f32 %v1065_v42, %v1160_v34  ;;  %v1049_v23 = vadd.f32 %v1048_v40, %v2376_v15  ;;  %v1438_v42 = vld [vmem:[%s2680_s4 + $0x98] sm:$0xff]  ;;  %v1440_v40 = vld [vmem:[%s2680_s4 + $0xa8] sm:$0xff] }
 0x655   : > { %1422 = vmax.xlane.f32.xlu1 %v1395_v20  ;;  %v1255_v32 = vadd.f32 %v1254_v49, %v2376_v15  ;;  %v1435_v49 = vld [vmem:[%s2680_s4 + $0x80] sm:$0xff] }
 0x656   : > { %v1358_v53 = vpop.f32.mrf.mxu1  ;;  %v1287_v58 = vmax.f32 %v1176_v51, %v1271_v44  ;;  %v1439_v51 = vld [vmem:[%s2680_s4 + $0xa0] sm:$0xff] }
 0x657   : > { %v1359_v21 = vadd.f32 %v1358_v53, %v2402_v22  ;;  %v1175_v22 = vmax.f32 %v1064_v0, %v1159_v1  ;;  %v1143_v26 = vpop.f32.mrf.mxu0  ;;  %v1265_v1 = vmax.f32 %v1238_v56, 0.0 }
 0x658   : > { %v1144_v48 = vadd.f32 %v1143_v26, %v2376_v15 }
 0x659   : > { %v1380_v61 = vmax.f32 %v1359_v21, 0.0  ;;  %v1286_v10 = vmax.f32 %v1175_v22, %v1270_v2  ;;  %v1129_v2 = vadd.f32 %v2482_v43, %v2410_v25  ;;  %v1377_v43 = vmax.f32 %v1351_v9, 0.0  ;;  %v1432_v25 = vld [vmem:[%s2122_s10] sm:$0x7f] }
 0x65a   : > { %v1161_v62 = vmax.f32 %v1144_v48, 0.0  ;;  %1885 = vmatpush.msk.msra.mxu3 %vm1482_vm8, %v1432_v25  ;;  %v1454_v25 = vld [vmem:[%s2681_s5 + $0x70] sm:$0xff] }
 0x65b   : > { %v1396_v52 = vmax.f32 %v1285_v59, %v1380_v61  ;;  %v1059_v59 = vmax.f32 %v1032_v39, 0.0  ;;  %v1066_v61 = vmax.f32 %v1049_v23, 0.0  ;;  %v1441_v23 = vld [vmem:[%s2680_s4 + $0xb0] sm:$0x3] }
 0x65d   : > { %1424 = vmax.xlane.f32.xlu2 %v1396_v52  ;;  %v1272_v52 = vmax.f32 %v1255_v32, 0.0  ;;  %v1177_v3 = vmax.f32 %v1066_v61, %v1161_v62  ;;  %v1446_v61 = vld [vmem:[%s2681_s5 + $0x50] sm:$0xff]  ;;  %v1447_v62 = vld [vmem:[%s2681_s5 + $0x58] sm:$0x3] }
 0x65e   : > { %v1360_v7 = vpop.f32.mrf.mxu1 }
 0x65f   : > { %v1361_v6 = vadd.f32 %v1360_v7, %v2384_v17  ;;  %v1169_v17 = vmax.f32 %v1058_v27, %v1153_v11  ;;  %v1288_v50 = vmax.f32 %v1177_v3, %v1272_v52  ;;  %v1445_v52 = vld [vmem:[%s2681_s5 + $0x48] sm:$0xff] }
 0x661   : > { %v1381_v16 = vmax.f32 %v1361_v6, 0.0  ;;  %v1280_v30 = vmax.f32 %v1169_v17, %v1264_v19  ;;  %v1155_v6 = vmax.f32 %v1129_v2, 0.0  ;;  %v1442_v17 = vld [vmem:[%s2680_s4 + $0xb8] sm:$0x3]  ;;  %v1444_v2 = vld [vmem:[%s2681_s5 + $0x40] sm:$0xff] }
 0x663   : > { %v1397_v36 = vmax.f32 %v1286_v10, %v1381_v16  ;;  %v1391_v60 = vmax.f32 %v1280_v30, %v1375_v38 }
 0x665   : > { %1426 = vmax.xlane.f32.xlu0 %v1397_v36 }
 0x666   : > { %v1363_v20 = vpop.f32.mrf.mxu1 }
 0x667   : > { %v1364_v53 = vadd.f32 %v1363_v20, %v2387_v18  ;;  %v1170_v18 = vmax.f32 %v1059_v59, %v1154_v33  ;;  %v1437_v20 = vld [vmem:[%s2680_s4 + $0x90] sm:$0xff] }
 0x669   : > { %v1382_v21 = vmax.f32 %v1364_v53, 0.0  ;;  %v1281_v22 = vmax.f32 %v1170_v18, %v1265_v1 }
 0x66b   : > { %v1398_v0 = vmax.f32 %v1287_v58, %v1382_v21  ;;  %v1392_v41 = vmax.f32 %v1281_v22, %v1376_v5  ;;  %v1443_v22 = vld [vmem:[%s2681_s5 + $0x38] sm:$0xff] }
 0x66d   : > { %1428 = vmax.xlane.f32.xlu1 %v1398_v0  ;;  %1414 = vmax.xlane.f32.xlu0 %v1391_v60 }
 0x66e   : > { %v1365_v57 = vpop.f32.mrf.mxu1 }
 0x66f   : > { %v1366_v7 = vadd.f32 %v1365_v57, %v2376_v15  ;;  %v1171_v15 = vmax.f32 %v1060_v31, %v1155_v6 }
 0x671   : > { %v1383_v8 = vmax.f32 %v1366_v7, 0.0  ;;  %v1282_v16 = vmax.f32 %v1171_v15, %v1266_v14  ;;  %v1450_v14 = vld [vmem:[%s2680_s4 + $0xe0] sm:$0xff]  ;;  %v1451_v15 = vld [vmem:[%s2680_s4 + $0xf0] sm:$0xff] }
 0x673   : > { %v1399_v10 = vmax.f32 %v1288_v50, %v1383_v8  ;;  %v1393_v27 = vmax.f32 %v1282_v16, %v1377_v43 }
 0x675   : > { %1416 = vmax.xlane.f32.xlu1 %v1392_v41  ;;  %1430 = vmax.xlane.f32.xlu2 %v1399_v10  ;;  %v1448_v41 = vld [vmem:[%s2680_s4 + $0xc0] sm:$0xff]  ;;  %v1449_v10 = vld [vmem:[%s2680_s4 + $0xd0] sm:$0xff] }
 0x676   : > { %1408 = vmax.xlane.f32.xlu0 %v2468_v28 }
 0x67d   : > { %1410 = vmax.xlane.f32.xlu1 %v2477_v37  ;;  %1418 = vmax.xlane.f32.xlu2 %v1393_v27  ;;  %v1434_v37 = vld [vmem:[%s2680_s4 + $0x78] sm:$0xff] }
 0x67e   : > { %1402 = vmax.xlane.f32.xlu0 %v2451_v47  ;;  %1886 = vmatmul.msk.f32.vlgmr.msra.gmra.mxu3 %vm1466_vm9, %v1434_v37 }
 0x685   : > { %1404 = vmax.xlane.f32.xlu1 %v2455_v4  ;;  %1412 = vmax.xlane.f32.xlu2 %v2486_v46 }
 0x68d   : > { %1406 = vmax.xlane.f32.xlu2 %v2461_v12 }
 0x695   : > { %1400 = vmax.xlane.f32.xlu2 %v2447_v54  ;;  %v1436_v54 = vld [vmem:[%s2680_s4 + $0x88] sm:$0xff] }
 0x696   : > { %1887 = vmatmul.msk.f32.gmra.mxu3 %vm1466_vm9, %v1436_v54 }
 0x69e   : > { %1888 = vmatmul.msk.f32.gmra.mxu3 %vm1466_vm9, %v1438_v42 }
 0x6a6   : > { %1889 = vmatmul.msk.f32.gmra.mxu3 %vm1466_vm9, %v1440_v40  ;;  %v1459_v40 = vld [vmem:[%s2680_s4 + $0x130] sm:$0xff] }
 0x6ae   : > { %1890 = vmatmul.msk.f32.gmra.mxu3 %vm1466_vm9, %v1442_v17 }
 0x6c0   : > { %v1421_v45 = vpop.xlane.xlu0 %1420 }
 0x6c8   : > { %v1423_v28 = vpop.xlane.xlu1 %1422 }
 0x6d0   : > { %v1425_v55 = vpop.xlane.xlu2 %1424 }
 0x6d8   : > { %v1427_v4 = vpop.xlane.xlu0 %1426 }
 0x6e0   : > { %v1429_v47 = vpop.xlane.xlu1 %1428  ;;  %v1415_v11 = vpop.xlane.xlu0 %1414 }
 0x6e8   : > { %v1431_v46 = vpop.xlane.xlu2 %1430  ;;  %v1417_v12 = vpop.xlane.xlu1 %1416 }
 0x6e9   : > { %1518 = vmatpush.msrb.mxu0 %v1431_v46  ;;  %v1409_v19 = vpop.xlane.xlu0 %1408 }
 0x6eb   : > { %1519 = vmatpush.msrb.mxu0 %v1429_v47 }
 0x6ed   : > { %1520 = vmatpush.msrb.mxu0 %v1427_v4  ;;  %v1452_v4 = vld [vmem:[%s2681_s5 + $0x60] sm:$0xff] }
 0x6ef   : > { %1521 = vmatpush.msrb.mxu0 %v1425_v55 }
 0x6f0   : > { %v1419_v13 = vpop.xlane.xlu2 %1418  ;;  %v1411_v34 = vpop.xlane.xlu1 %1410 }
 0x6f1   : > { %1522 = vmatpush.msrb.mxu0 %v1423_v28  ;;  %v1403_v39 = vpop.xlane.xlu0 %1402  ;;  %v1455_v28 = vld [vmem:[%s2681_s5 + $0x78] sm:$0xff] }
 0x6f3   : > { %1523 = vmatpush.msrb.mxu0 %v1421_v45  ;;  %v1453_v45 = vld [vmem:[%s2681_s5 + $0x68] sm:$0xff] }
 0x6f5   : > { %1524 = vmatpush.msrb.mxu0 %v1419_v13 }
 0x6f7   : > { %1525 = vmatpush.msrb.mxu0 %v1417_v12 }
 0x6f8   : > { %v1413_v36 = vpop.xlane.xlu2 %1412  ;;  %v1405_v44 = vpop.xlane.xlu1 %1404 }
 0x6f9   : > { %1526 = vmatpush.msrb.mxu0 %v1415_v11 }
 0x6fb   : > { %1527 = vmatpush.msrb.mxu0 %v1413_v36  ;;  %v1457_v36 = vld [vmem:[%s2680_s4 + $0x110] sm:$0xff] }
 0x6fd   : > { %1528 = vmatpush.msrb.mxu0 %v1411_v34  ;;  %v1456_v34 = vld [vmem:[%s2680_s4 + $0x100] sm:$0xff] }
 0x6ff   : > { %1529 = vmatpush.msrb.mxu0 %v1409_v19  ;;  %v1458_v19 = vld [vmem:[%s2680_s4 + $0x120] sm:$0xff] }
 0x700   : > { %v1407_v26 = vpop.xlane.xlu2 %1406 }
 0x701   : > { %1530 = vmatpush.msrb.mxu0 %v1407_v26  ;;  %v1503_v48 = vpop.f32.mrf.mxu3 }
 0x703   : > { %1531 = vmatpush.msrb.mxu0 %v1405_v44 }
 0x705   : > { %1532 = vmatpush.msrb.mxu0 %v1403_v39  ;;  %v1462_v39 = vld [vmem:[%s2681_s5 + $0x90] sm:$0xff] }
 0x708   : > { %v1401_v38 = vpop.xlane.xlu2 %1400 }
 0x709   : > { %1533 = vmatpush.msrb.mxu0 %v1401_v38  ;;  %v1461_v38 = vld [vmem:[%s2681_s5 + $0x88] sm:$0xff] }
 0x70a   : > { %1534 = vmatmul.f32.vlgmr.msrb.gmra.mxu0 %v1433_v29  ;;  %v1463_v29 = vld [vmem:[%s2681_s5 + $0x98] sm:$0xff] }
 0x712   : > { %1537 = vmatmul.f32.gmra.mxu0 %v1435_v49 }
 0x719   : > { %v1506_v30 = vpop.f32.mrf.mxu3 }
 0x71a   : > { %1540 = vmatmul.f32.gmra.mxu0 %v1437_v20 }
 0x721   : > { %v1509_v58 = vpop.f32.mrf.mxu3 }
 0x722   : > { %1543 = vmatmul.f32.gmra.mxu0 %v1439_v51 }
 0x729   : > { %v1512_v21 = vpop.f32.mrf.mxu3 }
 0x72a   : > { %1546 = vmatmul.f32.gmra.mxu0 %v1441_v23  ;;  %v1460_v23 = vld [vmem:[%s2681_s5 + $0x80] sm:$0xff] }
 0x731   : > { %v1515_v33 = vpop.f32.mrf.mxu3 }
 0x787   : > { %v1535_v53 = vpop.f32.mrf.mxu0 }
 0x788   : > { %v1536_v3 = vadd.f32 %v1535_v53, %v1503_v48 }
 0x78a   : > { %v1550_v8 = vadd.f32 %v1536_v3, %v1443_v22 }
 0x78c   : > { %v1555_v9 = vmax.f32 %v1550_v8, 0.0 }
 0x78f   : > { %v1538_v56 = vpop.f32.mrf.mxu0 }
 0x790   : > { %v1539_v18 = vadd.f32 %v1538_v56, %v1506_v30 }
 0x792   : > { %v1551_v24 = vadd.f32 %v1539_v18, %v1444_v2 }
 0x794   : > { %v1556_v6 = vmax.f32 %v1551_v24, 0.0 }
 0x797   : > { %v1541_v32 = vpop.f32.mrf.mxu0 }
 0x798   : > { %v1542_v0 = vadd.f32 %v1541_v32, %v1509_v58 }
 0x79a   : > { %v1552_v5 = vadd.f32 %v1542_v0, %v1445_v52 }
 0x79c   : > { %v1557_v31 = vmax.f32 %v1552_v5, 0.0 }
 0x79f   : > { %v1544_v59 = vpop.f32.mrf.mxu0 }
 0x7a0   : > { %v1545_v60 = vadd.f32 %v1544_v59, %v1512_v21  ;;  %v1464_v21 = vld [vmem:[%s2680_s4 + $0x140] sm:$0xf] }
 0x7a1   : > { %v1465_v59 = vld [vmem:[%s2681_s5 + $0xa0] sm:$0xf] }
 0x7a2   : > { %v1553_v35 = vadd.f32 %v1545_v60, %v1446_v61 }
 0x7a4   : > { %v1558_v50 = vmax.f32 %v1553_v35, 0.0 }
 0x7a7   : > { %v1547_v63 = vpop.f32.mrf.mxu0 }
 0x7a8   : > { %v1548_v1 = vadd.f32 %v1547_v63, %v1515_v33 }
 0x7aa   : > { %v1554_v57 = vadd.f32 %v1548_v1, %v1447_v62 }
 0x7ac   : > { %v1559_v7 = vmax.f32 %v1554_v57, 0.0 }
 0x7ae   : > { %1891 = vmatpush.msk.msrb.mxu3 %vm709_vm3, %v1559_v7 }
 0x7b0   : > { %1588 = vmatpush.msrb.mxu3 %v1558_v50 }
 0x7b2   : > { %1589 = vmatpush.msrb.mxu3 %v1557_v31 }
 0x7b4   : > { %1590 = vmatpush.msrb.mxu3 %v1556_v6 }
 0x7b6   : > { %1591 = vmatpush.msrb.mxu3 %v1555_v9 }
 0x7b7   : > { %1892 = vmatmul.msk.f32.vlgmr.msrb.gmra.mxu3 %vm1560_vm10, %v1448_v41 }
 0x7bf   : > { %1893 = vmatmul.msk.f32.gmra.mxu3 %vm1560_vm10, %v1449_v10 }
 0x7c7   : > { %1894 = vmatmul.msk.f32.gmra.mxu3 %vm1560_vm10, %v1450_v14 }
 0x7cf   : > { %1895 = vmatmul.msk.f32.gmra.mxu3 %vm1560_vm10, %v1451_v15 }
 0x83a   : > { %v1593_v43 = vpop.f32.mrf.mxu3 }
 0x83b   : > { %v1594_v12 = vadd.f32 %v1593_v43, %v1452_v4 }
 0x83d   : > { %v1605_v42 = vmax.f32 %v1594_v12, 0.0 }
 0x842   : > { %v1596_v16 = vpop.f32.mrf.mxu3 }
 0x843   : > { %v1597_v46 = vadd.f32 %v1596_v16, %v1453_v45 }
 0x845   : > { %v1606_v13 = vmax.f32 %v1597_v46, 0.0 }
 0x84a   : > { %v1599_v27 = vpop.f32.mrf.mxu3 }
 0x84b   : > { %v1600_v37 = vadd.f32 %v1599_v27, %v1454_v25 }
 0x84d   : > { %v1607_v11 = vmax.f32 %v1600_v37, 0.0 }
 0x852   : > { %v1602_v55 = vpop.f32.mrf.mxu3 }
 0x853   : > { %v1603_v47 = vadd.f32 %v1602_v55, %v1455_v28 }
 0x855   : > { %v1608_v54 = vmax.f32 %v1603_v47, 0.0 }
 0x857   : > { %1633 = vmatpush.msra.mxu2 %v1608_v54 }
 0x859   : > { %1634 = vmatpush.msra.mxu2 %v1607_v11 }
 0x85b   : > { %1635 = vmatpush.msra.mxu2 %v1606_v13 }
 0x85d   : > { %1636 = vmatpush.msra.mxu2 %v1605_v42 }
 0x85e   : > { %1896 = vmatmul.msk.f32.vlgmr.msra.gmra.mxu2 %vm597_vm2, %v1456_v34 }
 0x866   : > { %1897 = vmatmul.msk.f32.gmra.mxu2 %vm597_vm2, %v1457_v36 }
 0x86e   : > { %1898 = vmatmul.msk.f32.gmra.mxu2 %vm597_vm2, %v1458_v19 }
 0x876   : > { %1899 = vmatmul.msk.f32.gmra.mxu2 %vm597_vm2, %v1459_v40 }
 0x8e1   : > { %v1638_v26 = vpop.f32.mrf.mxu2 }
 0x8e2   : > { %v1639_v30 = vadd.f32 %v1638_v26, %v1460_v23 }
 0x8e4   : > { %v1650_v32 = vmax.f32 %v1639_v30, 0.0 }
 0x8e9   : > { %v1641_v44 = vpop.f32.mrf.mxu2 }
 0x8ea   : > { %v1642_v48 = vadd.f32 %v1641_v44, %v1461_v38 }
 0x8ec   : > { %v1651_v58 = vmax.f32 %v1642_v48, 0.0 }
 0x8f1   : > { %v1644_v17 = vpop.f32.mrf.mxu2 }
 0x8f2   : > { %v1645_v20 = vadd.f32 %v1644_v17, %v1462_v39 }
 0x8f4   : > { %v1652_v56 = vmax.f32 %v1645_v20, 0.0 }
 0x8f9   : > { %v1647_v49 = vpop.f32.mrf.mxu2 }
 0x8fa   : > { %v1648_v51 = vadd.f32 %v1647_v49, %v1463_v29 }
 0x8fc   : > { %v1653_v53 = vmax.f32 %v1648_v51, 0.0 }
 0x8fe   : > { %1669 = vmatpush.msra.mxu1 %v1653_v53 }
 0x900   : > { %1670 = vmatpush.msra.mxu1 %v1652_v56 }
 0x902   : > { %1671 = vmatpush.msra.mxu1 %v1651_v58 }
 0x904   : > { %1672 = vmatpush.msra.mxu1 %v1650_v32 }
 0x905   : > { %1900 = vmatmul.msk.f32.vlgmr.msra.gmra.mxu1 %vm597_vm2, %v1464_v21 }
 0x982   : > { %v1674_v33 = vpop.f32.mrf.mxu1 }
 0x983   : > { %v1675_v60 = vadd.f32 %v1674_v33, %v1465_v59 }
 0x985   : > { %1678 = vst.msk [vmem:[%s2127_s14] sm:$0xf] %vm1677_vm11, %v1675_v60 }
 0x986 PF: > { %s16_s25 = sadd.s32 1, %s2043_s25   ;;  %s2683_s21 = smov %s2035_s23 }
 0x987   : > { %p13_p9 = scmp.ge.s32.totalorder %s16_s25, 18   ;;  %s2684_s22 = smov %s2039_s24 }
 0x988   : > { %s2685_s23 = smov %s2688_s26  ;;  %s2686_s24 = smov %s2692_s27 }
 0x989   :  { %15 = sbr.rel (!%p13_p9) target bundleno = 3 (0x3), region = 89 }

</bundles_post_ra>
